<compile_context>
chip_gen: v6e
topology: v6e:2x2x1
jax: 0.10.0
libtpu: 0.0.40
codegen_flags: <defaults>
</compile_context>

<pallas_src>
import jax
import jax.numpy as jnp
from jax import lax
from jax.experimental import pallas as pl
from jax.experimental.pallas import tpu as pltpu


# ---------------------------------------------------------------- model cfg --
FEATURE_CFG = [8, 8, 'M', 16, 16, 'M']   # scaled-down VGG-'D' style config
IN_CHANNELS = 3
HIDDEN = 64
NUM_CLASSES = 10
H0 = W0 = 16                              # input spatial size
CIN_PAD = 8                               # pad 3 input channels up to 8 (sublane aligned)
CLS_PAD = 128                             # pad 10 logits to 128 lanes (unmasked store)


# ------------------------------------------------------------------- kernel --

def _vgg_fused_kernel(x_ref,
                      w1_ref, b1_ref, w2_ref, b2_ref,
                      w3_ref, b3_ref, w4_ref, b4_ref,
                      s1_ref, s2_ref, m1_ref, m2_ref,
                      fw1_ref, fb1_ref, fw2_ref, fb2_ref, fw3_ref, fb3_ref,
                      o_ref):
    """Entire VGG forward for one image, fully VMEM/vreg resident.

    Activations: (C, H*W), spatial on lanes, channels on sublanes.
    Conv: lane-shifted taps (zero-filled + border-masked), concatenated to a
    single (Cout, 9*Cin) @ (9*Cin, H*W) MXU dot.
    Pool: elementwise max of 4 shifted copies, then an exact 0/1 selection
    matmul that also does the stride-2 subsampling.
    Flatten order matches torch's NCHW .view(B, -1).
    """

    def shift_lanes(a, s):
        # t[:, p] = a[:, p + s], zero fill outside [0, L)
        c, l = a.shape
        if s == 0:
            return a
        if s > 0:
            return jnp.concatenate([a[:, s:], jnp.zeros((c, s), a.dtype)], axis=1)
        return jnp.concatenate([jnp.zeros((c, -s), a.dtype), a[:, :l + s]], axis=1)

    def conv3x3_relu(a, w_ref, b_ref, m_ref, w_img):
        # a: (Cin, HW)   w_ref: (Cout, 9*Cin)   m_ref: (9, 1, HW)
        taps = []
        for dy in range(3):
            for dx in range(3):
                t = dy * 3 + dx
                shifted = shift_lanes(a, (dy - 1) * w_img + (dx - 1))
                taps.append(shifted * m_ref[t])          # zero out-of-image taps
        xcol = jnp.concatenate(taps, axis=0)             # (9*Cin, HW) -> one big-K dot
        out = jnp.dot(w_ref[...], xcol, preferred_element_type=jnp.float32)
        out = out + b_ref[...]                           # (Cout, 1) lane-broadcast
        return jnp.maximum(out, 0.0)

    def maxpool2x2(a, sel_ref, w_img):
        # a: (C, HW) -> (C, HW // 4); sel_ref is an exact 0/1 subsample matrix.
        m = jnp.maximum(jnp.maximum(a, shift_lanes(a, 1)),
                        jnp.maximum(shift_lanes(a, w_img),
                                    shift_lanes(a, w_img + 1)))
        return jnp.dot(m, sel_ref[...], preferred_element_type=jnp.float32)

    a = x_ref[0]                                          # (8, 256)   16x16
    a = conv3x3_relu(a, w1_ref, b1_ref, m1_ref, W0)       # (8, 256)
    a = conv3x3_relu(a, w2_ref, b2_ref, m1_ref, W0)       # (8, 256)
    a = maxpool2x2(a, s1_ref, W0)                         # (8, 64)    8x8
    a = conv3x3_relu(a, w3_ref, b3_ref, m2_ref, W0 // 2)  # (16, 64)
    a = conv3x3_relu(a, w4_ref, b4_ref, m2_ref, W0 // 2)  # (16, 64)
    a = maxpool2x2(a, s2_ref, W0 // 2)                    # (16, 16)   4x4

    # Flatten in torch NCHW .view(B, -1) order: (C, HW) -> (1, C*HW).
    flat = jnp.concatenate([a[c:c + 1, :] for c in range(a.shape[0])], axis=1)

    h = jnp.dot(flat, fw1_ref[...], preferred_element_type=jnp.float32)
    h = jnp.maximum(h + fb1_ref[...], 0.0)
    # TODO(synk): nn.Dropout(p=0.9) / nn.Dropout(p=0.8) are identity in eval mode;
    # training-mode stochastic masking is not implemented.
    h = jnp.dot(h, fw2_ref[...], preferred_element_type=jnp.float32)
    h = jnp.maximum(h + fb2_ref[...], 0.0)
    y = jnp.dot(h, fw3_ref[...], preferred_element_type=jnp.float32)
    y = y + fb3_ref[...]                                  # (1, 128) lane-dense store
    o_ref[0] = y.astype(o_ref.dtype)


# -------------------------------------------------------- one-time weight prep

def _tap_masks(h_img, w_img):
    """(9, 1, H*W) 0/1 masks: valid (non-padding) positions for each 3x3 tap."""
    p = jnp.arange(h_img * w_img)
    hh, ww = p // w_img, p % w_img
    rows = []
    for dy in range(3):
        for dx in range(3):
            oy, ox = dy - 1, dx - 1
            valid = ((hh + oy >= 0) & (hh + oy < h_img) &
                     (ww + ox >= 0) & (ww + ox < w_img))
            rows.append(valid.astype(jnp.float32))
    return jnp.stack(rows, axis=0).reshape(9, 1, h_img * w_img)


def _pool_select(h_img, w_img):
    """(H*W, H/2*W/2) exact 0/1 matrix selecting the top-left corner of each 2x2 window."""
    h2, w2 = h_img // 2, w_img // 2
    idx = jnp.arange(h2 * w2)
    src = (2 * (idx // w2)) * w_img + 2 * (idx % w2)
    sel = jnp.zeros((h_img * w_img, h2 * w2), jnp.float32)
    return sel.at[src, idx].set(1.0)


def _conv_weight_mat(w, cin_pad):
    """(Cout, Cin, 3, 3) torch layout -> (Cout, 9*cin_pad), columns = (dy*3+dx)*Cin + ci."""
    cout, cin = w.shape[0], w.shape[1]
    wp = jnp.pad(w, ((0, 0), (0, cin_pad - cin), (0, 0), (0, 0)))
    return jnp.transpose(wp, (0, 2, 3, 1)).reshape(cout, 9 * cin_pad)


def init_params(key):
    """Deterministic raw (torch-layout) params mirroring VGG._initialize_weights()."""
    feats = []
    c = IN_CHANNELS
    for v in FEATURE_CFG:
        if v == 'M':
            feats.append('M')
            continue
        key, sub = jax.random.split(key)
        n = 3 * 3 * v                                    # kH*kW*out_channels
        w = jax.random.normal(sub, (v, c, 3, 3), jnp.float32) * jnp.sqrt(2.0 / n)
        b = jnp.zeros((v,), jnp.float32)
        feats.append((w, b))
        c = v
    flat = c * (H0 // 4) * (W0 // 4)                     # two 2x pools
    key, k1, k2, k3 = jax.random.split(key, 4)
    return {
        'features': feats,
        'fc1_w': jax.random.normal(k1, (HIDDEN, flat), jnp.float32) * 0.01,
        'fc1_b': jnp.zeros((HIDDEN,), jnp.float32),
        'fc2_w': jax.random.normal(k2, (HIDDEN, HIDDEN), jnp.float32) * 0.01,
        'fc2_b': jnp.zeros((HIDDEN,), jnp.float32),
        'fca_w': jax.random.normal(k3, (NUM_CLASSES, HIDDEN), jnp.float32) * 0.01,
        'fca_b': jnp.zeros((NUM_CLASSES,), jnp.float32),
    }


def prepare_params(raw):
    """One-time kernel-ready weight pack (transposes / pads hoisted out of the forward)."""
    convs = [layer for layer in raw['features'] if not isinstance(layer, str)]
    (w1, b1), (w2, b2), (w3, b3), (w4, b4) = convs
    return {
        'w1': _conv_weight_mat(w1, CIN_PAD),       'b1': b1.reshape(-1, 1),
        'w2': _conv_weight_mat(w2, w2.shape[1]),   'b2': b2.reshape(-1, 1),
        'w3': _conv_weight_mat(w3, w3.shape[1]),   'b3': b3.reshape(-1, 1),
        'w4': _conv_weight_mat(w4, w4.shape[1]),   'b4': b4.reshape(-1, 1),
        's1': _pool_select(H0, W0),
        's2': _pool_select(H0 // 2, W0 // 2),
        'm1': _tap_masks(H0, W0),
        'm2': _tap_masks(H0 // 2, W0 // 2),
        'fw1': raw['fc1_w'].T, 'fb1': raw['fc1_b'].reshape(1, -1),
        'fw2': raw['fc2_w'].T, 'fb2': raw['fc2_b'].reshape(1, -1),
        'fw3': jnp.pad(raw['fca_w'], ((0, CLS_PAD - NUM_CLASSES), (0, 0))).T,
        'fb3': jnp.pad(raw['fca_b'], (0, CLS_PAD - NUM_CLASSES)).reshape(1, -1),
    }


# ------------------------------------------------------------------ wrapper --

def _const_spec(arr):
    zero = (0,) * arr.ndim
    return pl.BlockSpec(arr.shape, lambda b, _z=zero: _z)


def vgg_forward(prepped, x_nchw):
    b, cin, h, w = x_nchw.shape
    assert (h, w) == (H0, W0) and cin == IN_CHANNELS
    hw = h * w
    # NCHW -> channels-on-sublanes, flattened-spatial-on-lanes; pad channels 3 -> 8.
    x = jnp.pad(x_nchw, ((0, 0), (0, CIN_PAD - cin), (0, 0), (0, 0)))
    x = x.reshape(b, CIN_PAD, hw)

    p = prepped
    operands = [x, p['w1'], p['b1'], p['w2'], p['b2'], p['w3'], p['b3'],
                p['w4'], p['b4'], p['s1'], p['s2'], p['m1'], p['m2'],
                p['fw1'], p['fb1'], p['fw2'], p['fb2'], p['fw3'], p['fb3']]
    in_specs = ([pl.BlockSpec((1, CIN_PAD, hw), lambda bb: (bb, 0, 0))] +
                [_const_spec(a) for a in operands[1:]])

    out = pl.pallas_call(
        _vgg_fused_kernel,
        out_shape=jax.ShapeDtypeStruct((b, 1, CLS_PAD), jnp.float32),
        grid=(b,),
        in_specs=in_specs,
        out_specs=pl.BlockSpec((1, 1, CLS_PAD), lambda bb: (bb, 0, 0)),
        compiler_params=pltpu.CompilerParams(
            dimension_semantics=("parallel",)),
    )(*operands)
    return out[:, 0, :NUM_CLASSES]


# ------------------------------------------------------------- pure-JAX ref --

def vgg_reference(raw, x_nchw):
    dn = ('NCHW', 'OIHW', 'NCHW')
    x = x_nchw
    for layer in raw['features']:
        if isinstance(layer, str):
            x = lax.reduce_window(x, -jnp.inf, lax.max,
                                  (1, 1, 2, 2), (1, 1, 2, 2), 'VALID')
        else:
            w, bb = layer
            x = lax.conv_general_dilated(x, w, (1, 1), 'SAME',
                                         dimension_numbers=dn,
                                         precision=lax.Precision.HIGHEST)
            x = jnp.maximum(x + bb[None, :, None, None], 0.0)
    x = x.reshape(x.shape[0], -1)
    x = jnp.maximum(jnp.dot(x, raw['fc1_w'].T,
                            precision=lax.Precision.HIGHEST) + raw['fc1_b'], 0.0)
    x = jnp.maximum(jnp.dot(x, raw['fc2_w'].T,
                            precision=lax.Precision.HIGHEST) + raw['fc2_b'], 0.0)
    return jnp.dot(x, raw['fca_w'].T,
                   precision=lax.Precision.HIGHEST) + raw['fca_b']


# -------------------------------------------------------------------- main ---

if __name__ == "__main__":
    key = jax.random.PRNGKey(0)
    key, pkey, xkey = jax.random.split(key, 3)
    raw = init_params(pkey)
    prepped = prepare_params(raw)
    x = jax.random.normal(xkey, (2, IN_CHANNELS, H0, W0), jnp.float32)  # NCHW input

    fwd = jax.jit(vgg_forward)
    out = jax.block_until_ready(fwd(prepped, x))
    assert out.shape == (2, NUM_CLASSES), out.shape
    assert bool(jnp.all(jnp.isfinite(out)))

    ref = jax.block_until_ready(vgg_reference(raw, x))
    assert bool(jnp.allclose(out, ref, rtol=1e-2, atol=1e-4)), (
        "max abs diff = %g" % float(jnp.max(jnp.abs(out - ref))))

    print("KERNEL_OK")
</pallas_src>

<mosaic_0001>
module attributes {stable_mosaic.version = 11 : i64} {
  func.func @_vgg_fused_kernel(%arg0: i32, %arg1: memref<1x8x256xf32, #tpu.memory_space<vmem>>, %arg2: memref<8x72xf32, #tpu.memory_space<vmem>>, %arg3: memref<8x1xf32, #tpu.memory_space<vmem>>, %arg4: memref<8x72xf32, #tpu.memory_space<vmem>>, %arg5: memref<8x1xf32, #tpu.memory_space<vmem>>, %arg6: memref<16x72xf32, #tpu.memory_space<vmem>>, %arg7: memref<16x1xf32, #tpu.memory_space<vmem>>, %arg8: memref<16x144xf32, #tpu.memory_space<vmem>>, %arg9: memref<16x1xf32, #tpu.memory_space<vmem>>, %arg10: memref<256x64xf32, #tpu.memory_space<vmem>>, %arg11: memref<64x16xf32, #tpu.memory_space<vmem>>, %arg12: memref<9x1x256xf32, #tpu.memory_space<vmem>>, %arg13: memref<9x1x64xf32, #tpu.memory_space<vmem>>, %arg14: memref<256x64xf32, #tpu.memory_space<vmem>>, %arg15: memref<1x64xf32, #tpu.memory_space<vmem>>, %arg16: memref<64x64xf32, #tpu.memory_space<vmem>>, %arg17: memref<1x64xf32, #tpu.memory_space<vmem>>, %arg18: memref<64x128xf32, #tpu.memory_space<vmem>>, %arg19: memref<1x128xf32, #tpu.memory_space<vmem>>, %arg20: memref<1x1x128xf32, #tpu.memory_space<vmem>>) attributes {dimension_semantics = [#tpu.dimension_semantics<parallel>], iteration_bounds = array<i64: 2>, scalar_prefetch = 0 : i64, scratch_operands = 0 : i64, tpu.core_type = #tpu.core_type<tc>, window_params = [{transform_indices = @transform_0, window_bounds = array<i64: 1, 8, 256>}, {pipeline_mode = #tpu.pipeline_mode<synchronous>, transform_indices = @transform_1, window_bounds = array<i64: 8, 72>}, {pipeline_mode = #tpu.pipeline_mode<synchronous>, transform_indices = @transform_2, window_bounds = array<i64: 8, 1>}, {pipeline_mode = #tpu.pipeline_mode<synchronous>, transform_indices = @transform_3, window_bounds = array<i64: 8, 72>}, {pipeline_mode = #tpu.pipeline_mode<synchronous>, transform_indices = @transform_4, window_bounds = array<i64: 8, 1>}, {pipeline_mode = #tpu.pipeline_mode<synchronous>, transform_indices = @transform_5, window_bounds = array<i64: 16, 72>}, {pipeline_mode = #tpu.pipeline_mode<synchronous>, transform_indices = @transform_6, window_bounds = array<i64: 16, 1>}, {pipeline_mode = #tpu.pipeline_mode<synchronous>, transform_indices = @transform_7, window_bounds = array<i64: 16, 144>}, {pipeline_mode = #tpu.pipeline_mode<synchronous>, transform_indices = @transform_8, window_bounds = array<i64: 16, 1>}, {pipeline_mode = #tpu.pipeline_mode<synchronous>, transform_indices = @transform_9, window_bounds = array<i64: 256, 64>}, {pipeline_mode = #tpu.pipeline_mode<synchronous>, transform_indices = @transform_10, window_bounds = array<i64: 64, 16>}, {pipeline_mode = #tpu.pipeline_mode<synchronous>, transform_indices = @transform_11, window_bounds = array<i64: 9, 1, 256>}, {pipeline_mode = #tpu.pipeline_mode<synchronous>, transform_indices = @transform_12, window_bounds = array<i64: 9, 1, 64>}, {pipeline_mode = #tpu.pipeline_mode<synchronous>, transform_indices = @transform_13, window_bounds = array<i64: 256, 64>}, {pipeline_mode = #tpu.pipeline_mode<synchronous>, transform_indices = @transform_14, window_bounds = array<i64: 1, 64>}, {pipeline_mode = #tpu.pipeline_mode<synchronous>, transform_indices = @transform_15, window_bounds = array<i64: 64, 64>}, {pipeline_mode = #tpu.pipeline_mode<synchronous>, transform_indices = @transform_16, window_bounds = array<i64: 1, 64>}, {pipeline_mode = #tpu.pipeline_mode<synchronous>, transform_indices = @transform_17, window_bounds = array<i64: 64, 128>}, {pipeline_mode = #tpu.pipeline_mode<synchronous>, transform_indices = @transform_18, window_bounds = array<i64: 1, 128>}, {transform_indices = @transform_19, window_bounds = array<i64: 1, 1, 128>}]} {
    %c0 = arith.constant 0 : index
    %c0_0 = arith.constant 0 : index
    %c0_1 = arith.constant 0 : index
    %0 = vector.load %arg1[%c0, %c0_0, %c0_1] : memref<1x8x256xf32, #tpu.memory_space<vmem>>, vector<1x8x256xf32>
    %1 = vector.shape_cast %0 : vector<1x8x256xf32> to vector<8x256xf32>
    %cst = arith.constant 0.000000e+00 : f32
    %2 = vector.broadcast %cst : f32 to vector<8x17xf32>
    %3 = vector.extract_strided_slice %1 {offsets = [0, 0], sizes = [8, 239], strides = [1, 1]} : vector<8x256xf32> to vector<8x239xf32>
    %4 = tpu.concatenate %2, %3 in 1 : vector<8x17xf32>, vector<8x239xf32> -> vector<8x256xf32>
    %c0_2 = arith.constant 0 : index
    %c0_3 = arith.constant 0 : index
    %c0_4 = arith.constant 0 : index
    %5 = vector.load %arg12[%c0_2, %c0_3, %c0_4] : memref<9x1x256xf32, #tpu.memory_space<vmem>>, vector<1x1x256xf32>
    %6 = vector.shape_cast %5 : vector<1x1x256xf32> to vector<1x256xf32>
    %7 = vector.broadcast %6 : vector<1x256xf32> to vector<8x256xf32>
    %8 = arith.mulf %4, %7 : vector<8x256xf32>
    %cst_5 = arith.constant 0.000000e+00 : f32
    %9 = vector.broadcast %cst_5 : f32 to vector<8x16xf32>
    %10 = vector.extract_strided_slice %1 {offsets = [0, 0], sizes = [8, 240], strides = [1, 1]} : vector<8x256xf32> to vector<8x240xf32>
    %11 = tpu.concatenate %9, %10 in 1 : vector<8x16xf32>, vector<8x240xf32> -> vector<8x256xf32>
    %c1 = arith.constant 1 : index
    %c0_6 = arith.constant 0 : index
    %c0_7 = arith.constant 0 : index
    %12 = vector.load %arg12[%c1, %c0_6, %c0_7] : memref<9x1x256xf32, #tpu.memory_space<vmem>>, vector<1x1x256xf32>
    %13 = vector.shape_cast %12 : vector<1x1x256xf32> to vector<1x256xf32>
    %14 = vector.broadcast %13 : vector<1x256xf32> to vector<8x256xf32>
    %15 = arith.mulf %11, %14 : vector<8x256xf32>
    %cst_8 = arith.constant 0.000000e+00 : f32
    %16 = vector.broadcast %cst_8 : f32 to vector<8x15xf32>
    %17 = vector.extract_strided_slice %1 {offsets = [0, 0], sizes = [8, 241], strides = [1, 1]} : vector<8x256xf32> to vector<8x241xf32>
    %18 = tpu.concatenate %16, %17 in 1 : vector<8x15xf32>, vector<8x241xf32> -> vector<8x256xf32>
    %c2 = arith.constant 2 : index
    %c0_9 = arith.constant 0 : index
    %c0_10 = arith.constant 0 : index
    %19 = vector.load %arg12[%c2, %c0_9, %c0_10] : memref<9x1x256xf32, #tpu.memory_space<vmem>>, vector<1x1x256xf32>
    %20 = vector.shape_cast %19 : vector<1x1x256xf32> to vector<1x256xf32>
    %21 = vector.broadcast %20 : vector<1x256xf32> to vector<8x256xf32>
    %22 = arith.mulf %18, %21 : vector<8x256xf32>
    %cst_11 = arith.constant 0.000000e+00 : f32
    %23 = vector.broadcast %cst_11 : f32 to vector<8x1xf32>
    %24 = vector.extract_strided_slice %1 {offsets = [0, 0], sizes = [8, 255], strides = [1, 1]} : vector<8x256xf32> to vector<8x255xf32>
    %25 = tpu.concatenate %23, %24 in 1 : vector<8x1xf32>, vector<8x255xf32> -> vector<8x256xf32>
    %c3 = arith.constant 3 : index
    %c0_12 = arith.constant 0 : index
    %c0_13 = arith.constant 0 : index
    %26 = vector.load %arg12[%c3, %c0_12, %c0_13] : memref<9x1x256xf32, #tpu.memory_space<vmem>>, vector<1x1x256xf32>
    %27 = vector.shape_cast %26 : vector<1x1x256xf32> to vector<1x256xf32>
    %28 = vector.broadcast %27 : vector<1x256xf32> to vector<8x256xf32>
    %29 = arith.mulf %25, %28 : vector<8x256xf32>
    %c4 = arith.constant 4 : index
    %c0_14 = arith.constant 0 : index
    %c0_15 = arith.constant 0 : index
    %30 = vector.load %arg12[%c4, %c0_14, %c0_15] : memref<9x1x256xf32, #tpu.memory_space<vmem>>, vector<1x1x256xf32>
    %31 = vector.shape_cast %30 : vector<1x1x256xf32> to vector<1x256xf32>
    %32 = vector.broadcast %31 : vector<1x256xf32> to vector<8x256xf32>
    %33 = arith.mulf %1, %32 : vector<8x256xf32>
    %34 = vector.extract_strided_slice %1 {offsets = [0, 1], sizes = [8, 255], strides = [1, 1]} : vector<8x256xf32> to vector<8x255xf32>
    %cst_16 = arith.constant 0.000000e+00 : f32
    %35 = vector.broadcast %cst_16 : f32 to vector<8x1xf32>
    %36 = tpu.concatenate %34, %35 in 1 : vector<8x255xf32>, vector<8x1xf32> -> vector<8x256xf32>
    %c5 = arith.constant 5 : index
    %c0_17 = arith.constant 0 : index
    %c0_18 = arith.constant 0 : index
    %37 = vector.load %arg12[%c5, %c0_17, %c0_18] : memref<9x1x256xf32, #tpu.memory_space<vmem>>, vector<1x1x256xf32>
    %38 = vector.shape_cast %37 : vector<1x1x256xf32> to vector<1x256xf32>
    %39 = vector.broadcast %38 : vector<1x256xf32> to vector<8x256xf32>
    %40 = arith.mulf %36, %39 : vector<8x256xf32>
    %41 = vector.extract_strided_slice %1 {offsets = [0, 15], sizes = [8, 241], strides = [1, 1]} : vector<8x256xf32> to vector<8x241xf32>
    %cst_19 = arith.constant 0.000000e+00 : f32
    %42 = vector.broadcast %cst_19 : f32 to vector<8x15xf32>
    %43 = tpu.concatenate %41, %42 in 1 : vector<8x241xf32>, vector<8x15xf32> -> vector<8x256xf32>
    %c6 = arith.constant 6 : index
    %c0_20 = arith.constant 0 : index
    %c0_21 = arith.constant 0 : index
    %44 = vector.load %arg12[%c6, %c0_20, %c0_21] : memref<9x1x256xf32, #tpu.memory_space<vmem>>, vector<1x1x256xf32>
    %45 = vector.shape_cast %44 : vector<1x1x256xf32> to vector<1x256xf32>
    %46 = vector.broadcast %45 : vector<1x256xf32> to vector<8x256xf32>
    %47 = arith.mulf %43, %46 : vector<8x256xf32>
    %48 = vector.extract_strided_slice %1 {offsets = [0, 16], sizes = [8, 240], strides = [1, 1]} : vector<8x256xf32> to vector<8x240xf32>
    %cst_22 = arith.constant 0.000000e+00 : f32
    %49 = vector.broadcast %cst_22 : f32 to vector<8x16xf32>
    %50 = tpu.concatenate %48, %49 in 1 : vector<8x240xf32>, vector<8x16xf32> -> vector<8x256xf32>
    %c7 = arith.constant 7 : index
    %c0_23 = arith.constant 0 : index
    %c0_24 = arith.constant 0 : index
    %51 = vector.load %arg12[%c7, %c0_23, %c0_24] : memref<9x1x256xf32, #tpu.memory_space<vmem>>, vector<1x1x256xf32>
    %52 = vector.shape_cast %51 : vector<1x1x256xf32> to vector<1x256xf32>
    %53 = vector.broadcast %52 : vector<1x256xf32> to vector<8x256xf32>
    %54 = arith.mulf %50, %53 : vector<8x256xf32>
    %55 = vector.extract_strided_slice %1 {offsets = [0, 17], sizes = [8, 239], strides = [1, 1]} : vector<8x256xf32> to vector<8x239xf32>
    %cst_25 = arith.constant 0.000000e+00 : f32
    %56 = vector.broadcast %cst_25 : f32 to vector<8x17xf32>
    %57 = tpu.concatenate %55, %56 in 1 : vector<8x239xf32>, vector<8x17xf32> -> vector<8x256xf32>
    %c8 = arith.constant 8 : index
    %c0_26 = arith.constant 0 : index
    %c0_27 = arith.constant 0 : index
    %58 = vector.load %arg12[%c8, %c0_26, %c0_27] : memref<9x1x256xf32, #tpu.memory_space<vmem>>, vector<1x1x256xf32>
    %59 = vector.shape_cast %58 : vector<1x1x256xf32> to vector<1x256xf32>
    %60 = vector.broadcast %59 : vector<1x256xf32> to vector<8x256xf32>
    %61 = arith.mulf %57, %60 : vector<8x256xf32>
    %62 = tpu.concatenate %8, %15, %22, %29, %33, %40, %47, %54, %61 in 0 : vector<8x256xf32>, vector<8x256xf32>, vector<8x256xf32>, vector<8x256xf32>, vector<8x256xf32>, vector<8x256xf32>, vector<8x256xf32>, vector<8x256xf32>, vector<8x256xf32> -> vector<72x256xf32>
    %c0_28 = arith.constant 0 : index
    %c0_29 = arith.constant 0 : index
    %63 = vector.load %arg2[%c0_28, %c0_29] : memref<8x72xf32, #tpu.memory_space<vmem>>, vector<8x72xf32>
    %cst_30 = arith.constant dense<0.000000e+00> : vector<8x256xf32>
    %64 = tpu.matmul %63, %62, %cst_30 {dimension_numbers = #tpu.dot_dimension_numbers<[1], [0], [0], [1], [0, 0, 1, 1], [], []>} : vector<8x72xf32>, vector<72x256xf32>, vector<8x256xf32> -> vector<8x256xf32>
    %c0_31 = arith.constant 0 : index
    %c0_32 = arith.constant 0 : index
    %65 = vector.load %arg3[%c0_31, %c0_32] : memref<8x1xf32, #tpu.memory_space<vmem>>, vector<8x1xf32>
    %66 = vector.broadcast %65 : vector<8x1xf32> to vector<8x256xf32>
    %67 = arith.addf %64, %66 : vector<8x256xf32>
    %cst_33 = arith.constant 0.000000e+00 : f32
    %68 = vector.broadcast %cst_33 : f32 to vector<8x256xf32>
    %69 = arith.maximumf %67, %68 : vector<8x256xf32>
    %cst_34 = arith.constant 0.000000e+00 : f32
    %70 = vector.broadcast %cst_34 : f32 to vector<8x17xf32>
    %71 = vector.extract_strided_slice %69 {offsets = [0, 0], sizes = [8, 239], strides = [1, 1]} : vector<8x256xf32> to vector<8x239xf32>
    %72 = tpu.concatenate %70, %71 in 1 : vector<8x17xf32>, vector<8x239xf32> -> vector<8x256xf32>
    %c0_35 = arith.constant 0 : index
    %c0_36 = arith.constant 0 : index
    %c0_37 = arith.constant 0 : index
    %73 = vector.load %arg12[%c0_35, %c0_36, %c0_37] : memref<9x1x256xf32, #tpu.memory_space<vmem>>, vector<1x1x256xf32>
    %74 = vector.shape_cast %73 : vector<1x1x256xf32> to vector<1x256xf32>
    %75 = vector.broadcast %74 : vector<1x256xf32> to vector<8x256xf32>
    %76 = arith.mulf %72, %75 : vector<8x256xf32>
    %cst_38 = arith.constant 0.000000e+00 : f32
    %77 = vector.broadcast %cst_38 : f32 to vector<8x16xf32>
    %78 = vector.extract_strided_slice %69 {offsets = [0, 0], sizes = [8, 240], strides = [1, 1]} : vector<8x256xf32> to vector<8x240xf32>
    %79 = tpu.concatenate %77, %78 in 1 : vector<8x16xf32>, vector<8x240xf32> -> vector<8x256xf32>
    %c1_39 = arith.constant 1 : index
    %c0_40 = arith.constant 0 : index
    %c0_41 = arith.constant 0 : index
    %80 = vector.load %arg12[%c1_39, %c0_40, %c0_41] : memref<9x1x256xf32, #tpu.memory_space<vmem>>, vector<1x1x256xf32>
    %81 = vector.shape_cast %80 : vector<1x1x256xf32> to vector<1x256xf32>
    %82 = vector.broadcast %81 : vector<1x256xf32> to vector<8x256xf32>
    %83 = arith.mulf %79, %82 : vector<8x256xf32>
    %cst_42 = arith.constant 0.000000e+00 : f32
    %84 = vector.broadcast %cst_42 : f32 to vector<8x15xf32>
    %85 = vector.extract_strided_slice %69 {offsets = [0, 0], sizes = [8, 241], strides = [1, 1]} : vector<8x256xf32> to vector<8x241xf32>
    %86 = tpu.concatenate %84, %85 in 1 : vector<8x15xf32>, vector<8x241xf32> -> vector<8x256xf32>
    %c2_43 = arith.constant 2 : index
    %c0_44 = arith.constant 0 : index
    %c0_45 = arith.constant 0 : index
    %87 = vector.load %arg12[%c2_43, %c0_44, %c0_45] : memref<9x1x256xf32, #tpu.memory_space<vmem>>, vector<1x1x256xf32>
    %88 = vector.shape_cast %87 : vector<1x1x256xf32> to vector<1x256xf32>
    %89 = vector.broadcast %88 : vector<1x256xf32> to vector<8x256xf32>
    %90 = arith.mulf %86, %89 : vector<8x256xf32>
    %cst_46 = arith.constant 0.000000e+00 : f32
    %91 = vector.broadcast %cst_46 : f32 to vector<8x1xf32>
    %92 = vector.extract_strided_slice %69 {offsets = [0, 0], sizes = [8, 255], strides = [1, 1]} : vector<8x256xf32> to vector<8x255xf32>
    %93 = tpu.concatenate %91, %92 in 1 : vector<8x1xf32>, vector<8x255xf32> -> vector<8x256xf32>
    %c3_47 = arith.constant 3 : index
    %c0_48 = arith.constant 0 : index
    %c0_49 = arith.constant 0 : index
    %94 = vector.load %arg12[%c3_47, %c0_48, %c0_49] : memref<9x1x256xf32, #tpu.memory_space<vmem>>, vector<1x1x256xf32>
    %95 = vector.shape_cast %94 : vector<1x1x256xf32> to vector<1x256xf32>
    %96 = vector.broadcast %95 : vector<1x256xf32> to vector<8x256xf32>
    %97 = arith.mulf %93, %96 : vector<8x256xf32>
    %c4_50 = arith.constant 4 : index
    %c0_51 = arith.constant 0 : index
    %c0_52 = arith.constant 0 : index
    %98 = vector.load %arg12[%c4_50, %c0_51, %c0_52] : memref<9x1x256xf32, #tpu.memory_space<vmem>>, vector<1x1x256xf32>
    %99 = vector.shape_cast %98 : vector<1x1x256xf32> to vector<1x256xf32>
    %100 = vector.broadcast %99 : vector<1x256xf32> to vector<8x256xf32>
    %101 = arith.mulf %69, %100 : vector<8x256xf32>
    %102 = vector.extract_strided_slice %69 {offsets = [0, 1], sizes = [8, 255], strides = [1, 1]} : vector<8x256xf32> to vector<8x255xf32>
    %cst_53 = arith.constant 0.000000e+00 : f32
    %103 = vector.broadcast %cst_53 : f32 to vector<8x1xf32>
    %104 = tpu.concatenate %102, %103 in 1 : vector<8x255xf32>, vector<8x1xf32> -> vector<8x256xf32>
    %c5_54 = arith.constant 5 : index
    %c0_55 = arith.constant 0 : index
    %c0_56 = arith.constant 0 : index
    %105 = vector.load %arg12[%c5_54, %c0_55, %c0_56] : memref<9x1x256xf32, #tpu.memory_space<vmem>>, vector<1x1x256xf32>
    %106 = vector.shape_cast %105 : vector<1x1x256xf32> to vector<1x256xf32>
    %107 = vector.broadcast %106 : vector<1x256xf32> to vector<8x256xf32>
    %108 = arith.mulf %104, %107 : vector<8x256xf32>
    %109 = vector.extract_strided_slice %69 {offsets = [0, 15], sizes = [8, 241], strides = [1, 1]} : vector<8x256xf32> to vector<8x241xf32>
    %cst_57 = arith.constant 0.000000e+00 : f32
    %110 = vector.broadcast %cst_57 : f32 to vector<8x15xf32>
    %111 = tpu.concatenate %109, %110 in 1 : vector<8x241xf32>, vector<8x15xf32> -> vector<8x256xf32>
    %c6_58 = arith.constant 6 : index
    %c0_59 = arith.constant 0 : index
    %c0_60 = arith.constant 0 : index
    %112 = vector.load %arg12[%c6_58, %c0_59, %c0_60] : memref<9x1x256xf32, #tpu.memory_space<vmem>>, vector<1x1x256xf32>
    %113 = vector.shape_cast %112 : vector<1x1x256xf32> to vector<1x256xf32>
    %114 = vector.broadcast %113 : vector<1x256xf32> to vector<8x256xf32>
    %115 = arith.mulf %111, %114 : vector<8x256xf32>
    %116 = vector.extract_strided_slice %69 {offsets = [0, 16], sizes = [8, 240], strides = [1, 1]} : vector<8x256xf32> to vector<8x240xf32>
    %cst_61 = arith.constant 0.000000e+00 : f32
    %117 = vector.broadcast %cst_61 : f32 to vector<8x16xf32>
    %118 = tpu.concatenate %116, %117 in 1 : vector<8x240xf32>, vector<8x16xf32> -> vector<8x256xf32>
    %c7_62 = arith.constant 7 : index
    %c0_63 = arith.constant 0 : index
    %c0_64 = arith.constant 0 : index
    %119 = vector.load %arg12[%c7_62, %c0_63, %c0_64] : memref<9x1x256xf32, #tpu.memory_space<vmem>>, vector<1x1x256xf32>
    %120 = vector.shape_cast %119 : vector<1x1x256xf32> to vector<1x256xf32>
    %121 = vector.broadcast %120 : vector<1x256xf32> to vector<8x256xf32>
    %122 = arith.mulf %118, %121 : vector<8x256xf32>
    %123 = vector.extract_strided_slice %69 {offsets = [0, 17], sizes = [8, 239], strides = [1, 1]} : vector<8x256xf32> to vector<8x239xf32>
    %cst_65 = arith.constant 0.000000e+00 : f32
    %124 = vector.broadcast %cst_65 : f32 to vector<8x17xf32>
    %125 = tpu.concatenate %123, %124 in 1 : vector<8x239xf32>, vector<8x17xf32> -> vector<8x256xf32>
    %c8_66 = arith.constant 8 : index
    %c0_67 = arith.constant 0 : index
    %c0_68 = arith.constant 0 : index
    %126 = vector.load %arg12[%c8_66, %c0_67, %c0_68] : memref<9x1x256xf32, #tpu.memory_space<vmem>>, vector<1x1x256xf32>
    %127 = vector.shape_cast %126 : vector<1x1x256xf32> to vector<1x256xf32>
    %128 = vector.broadcast %127 : vector<1x256xf32> to vector<8x256xf32>
    %129 = arith.mulf %125, %128 : vector<8x256xf32>
    %130 = tpu.concatenate %76, %83, %90, %97, %101, %108, %115, %122, %129 in 0 : vector<8x256xf32>, vector<8x256xf32>, vector<8x256xf32>, vector<8x256xf32>, vector<8x256xf32>, vector<8x256xf32>, vector<8x256xf32>, vector<8x256xf32>, vector<8x256xf32> -> vector<72x256xf32>
    %c0_69 = arith.constant 0 : index
    %c0_70 = arith.constant 0 : index
    %131 = vector.load %arg4[%c0_69, %c0_70] : memref<8x72xf32, #tpu.memory_space<vmem>>, vector<8x72xf32>
    %cst_71 = arith.constant dense<0.000000e+00> : vector<8x256xf32>
    %132 = tpu.matmul %131, %130, %cst_71 {dimension_numbers = #tpu.dot_dimension_numbers<[1], [0], [0], [1], [0, 0, 1, 1], [], []>} : vector<8x72xf32>, vector<72x256xf32>, vector<8x256xf32> -> vector<8x256xf32>
    %c0_72 = arith.constant 0 : index
    %c0_73 = arith.constant 0 : index
    %133 = vector.load %arg5[%c0_72, %c0_73] : memref<8x1xf32, #tpu.memory_space<vmem>>, vector<8x1xf32>
    %134 = vector.broadcast %133 : vector<8x1xf32> to vector<8x256xf32>
    %135 = arith.addf %132, %134 : vector<8x256xf32>
    %cst_74 = arith.constant 0.000000e+00 : f32
    %136 = vector.broadcast %cst_74 : f32 to vector<8x256xf32>
    %137 = arith.maximumf %135, %136 : vector<8x256xf32>
    %138 = vector.extract_strided_slice %137 {offsets = [0, 1], sizes = [8, 255], strides = [1, 1]} : vector<8x256xf32> to vector<8x255xf32>
    %cst_75 = arith.constant 0.000000e+00 : f32
    %139 = vector.broadcast %cst_75 : f32 to vector<8x1xf32>
    %140 = tpu.concatenate %138, %139 in 1 : vector<8x255xf32>, vector<8x1xf32> -> vector<8x256xf32>
    %141 = arith.maximumf %137, %140 : vector<8x256xf32>
    %142 = vector.extract_strided_slice %137 {offsets = [0, 16], sizes = [8, 240], strides = [1, 1]} : vector<8x256xf32> to vector<8x240xf32>
    %cst_76 = arith.constant 0.000000e+00 : f32
    %143 = vector.broadcast %cst_76 : f32 to vector<8x16xf32>
    %144 = tpu.concatenate %142, %143 in 1 : vector<8x240xf32>, vector<8x16xf32> -> vector<8x256xf32>
    %145 = vector.extract_strided_slice %137 {offsets = [0, 17], sizes = [8, 239], strides = [1, 1]} : vector<8x256xf32> to vector<8x239xf32>
    %cst_77 = arith.constant 0.000000e+00 : f32
    %146 = vector.broadcast %cst_77 : f32 to vector<8x17xf32>
    %147 = tpu.concatenate %145, %146 in 1 : vector<8x239xf32>, vector<8x17xf32> -> vector<8x256xf32>
    %148 = arith.maximumf %144, %147 : vector<8x256xf32>
    %149 = arith.maximumf %141, %148 : vector<8x256xf32>
    %c0_78 = arith.constant 0 : index
    %c0_79 = arith.constant 0 : index
    %150 = vector.load %arg10[%c0_78, %c0_79] : memref<256x64xf32, #tpu.memory_space<vmem>>, vector<256x64xf32>
    %cst_80 = arith.constant dense<0.000000e+00> : vector<8x64xf32>
    %151 = tpu.matmul %149, %150, %cst_80 {dimension_numbers = #tpu.dot_dimension_numbers<[1], [0], [0], [1], [0, 0, 1, 1], [], []>} : vector<8x256xf32>, vector<256x64xf32>, vector<8x64xf32> -> vector<8x64xf32>
    %cst_81 = arith.constant 0.000000e+00 : f32
    %152 = vector.broadcast %cst_81 : f32 to vector<8x9xf32>
    %153 = vector.extract_strided_slice %151 {offsets = [0, 0], sizes = [8, 55], strides = [1, 1]} : vector<8x64xf32> to vector<8x55xf32>
    %154 = tpu.concatenate %152, %153 in 1 : vector<8x9xf32>, vector<8x55xf32> -> vector<8x64xf32>
    %c0_82 = arith.constant 0 : index
    %c0_83 = arith.constant 0 : index
    %c0_84 = arith.constant 0 : index
    %155 = vector.load %arg13[%c0_82, %c0_83, %c0_84] : memref<9x1x64xf32, #tpu.memory_space<vmem>>, vector<1x1x64xf32>
    %156 = vector.shape_cast %155 : vector<1x1x64xf32> to vector<1x64xf32>
    %157 = vector.broadcast %156 : vector<1x64xf32> to vector<8x64xf32>
    %158 = arith.mulf %154, %157 : vector<8x64xf32>
    %cst_85 = arith.constant 0.000000e+00 : f32
    %159 = vector.broadcast %cst_85 : f32 to vector<8x8xf32>
    %160 = vector.extract_strided_slice %151 {offsets = [0, 0], sizes = [8, 56], strides = [1, 1]} : vector<8x64xf32> to vector<8x56xf32>
    %161 = tpu.concatenate %159, %160 in 1 : vector<8x8xf32>, vector<8x56xf32> -> vector<8x64xf32>
    %c1_86 = arith.constant 1 : index
    %c0_87 = arith.constant 0 : index
    %c0_88 = arith.constant 0 : index
    %162 = vector.load %arg13[%c1_86, %c0_87, %c0_88] : memref<9x1x64xf32, #tpu.memory_space<vmem>>, vector<1x1x64xf32>
    %163 = vector.shape_cast %162 : vector<1x1x64xf32> to vector<1x64xf32>
    %164 = vector.broadcast %163 : vector<1x64xf32> to vector<8x64xf32>
    %165 = arith.mulf %161, %164 : vector<8x64xf32>
    %cst_89 = arith.constant 0.000000e+00 : f32
    %166 = vector.broadcast %cst_89 : f32 to vector<8x7xf32>
    %167 = vector.extract_strided_slice %151 {offsets = [0, 0], sizes = [8, 57], strides = [1, 1]} : vector<8x64xf32> to vector<8x57xf32>
    %168 = tpu.concatenate %166, %167 in 1 : vector<8x7xf32>, vector<8x57xf32> -> vector<8x64xf32>
    %c2_90 = arith.constant 2 : index
    %c0_91 = arith.constant 0 : index
    %c0_92 = arith.constant 0 : index
    %169 = vector.load %arg13[%c2_90, %c0_91, %c0_92] : memref<9x1x64xf32, #tpu.memory_space<vmem>>, vector<1x1x64xf32>
    %170 = vector.shape_cast %169 : vector<1x1x64xf32> to vector<1x64xf32>
    %171 = vector.broadcast %170 : vector<1x64xf32> to vector<8x64xf32>
    %172 = arith.mulf %168, %171 : vector<8x64xf32>
    %cst_93 = arith.constant 0.000000e+00 : f32
    %173 = vector.broadcast %cst_93 : f32 to vector<8x1xf32>
    %174 = vector.extract_strided_slice %151 {offsets = [0, 0], sizes = [8, 63], strides = [1, 1]} : vector<8x64xf32> to vector<8x63xf32>
    %175 = tpu.concatenate %173, %174 in 1 : vector<8x1xf32>, vector<8x63xf32> -> vector<8x64xf32>
    %c3_94 = arith.constant 3 : index
    %c0_95 = arith.constant 0 : index
    %c0_96 = arith.constant 0 : index
    %176 = vector.load %arg13[%c3_94, %c0_95, %c0_96] : memref<9x1x64xf32, #tpu.memory_space<vmem>>, vector<1x1x64xf32>
    %177 = vector.shape_cast %176 : vector<1x1x64xf32> to vector<1x64xf32>
    %178 = vector.broadcast %177 : vector<1x64xf32> to vector<8x64xf32>
    %179 = arith.mulf %175, %178 : vector<8x64xf32>
    %c4_97 = arith.constant 4 : index
    %c0_98 = arith.constant 0 : index
    %c0_99 = arith.constant 0 : index
    %180 = vector.load %arg13[%c4_97, %c0_98, %c0_99] : memref<9x1x64xf32, #tpu.memory_space<vmem>>, vector<1x1x64xf32>
    %181 = vector.shape_cast %180 : vector<1x1x64xf32> to vector<1x64xf32>
    %182 = vector.broadcast %181 : vector<1x64xf32> to vector<8x64xf32>
    %183 = arith.mulf %151, %182 : vector<8x64xf32>
    %184 = vector.extract_strided_slice %151 {offsets = [0, 1], sizes = [8, 63], strides = [1, 1]} : vector<8x64xf32> to vector<8x63xf32>
    %cst_100 = arith.constant 0.000000e+00 : f32
    %185 = vector.broadcast %cst_100 : f32 to vector<8x1xf32>
    %186 = tpu.concatenate %184, %185 in 1 : vector<8x63xf32>, vector<8x1xf32> -> vector<8x64xf32>
    %c5_101 = arith.constant 5 : index
    %c0_102 = arith.constant 0 : index
    %c0_103 = arith.constant 0 : index
    %187 = vector.load %arg13[%c5_101, %c0_102, %c0_103] : memref<9x1x64xf32, #tpu.memory_space<vmem>>, vector<1x1x64xf32>
    %188 = vector.shape_cast %187 : vector<1x1x64xf32> to vector<1x64xf32>
    %189 = vector.broadcast %188 : vector<1x64xf32> to vector<8x64xf32>
    %190 = arith.mulf %186, %189 : vector<8x64xf32>
    %191 = vector.extract_strided_slice %151 {offsets = [0, 7], sizes = [8, 57], strides = [1, 1]} : vector<8x64xf32> to vector<8x57xf32>
    %cst_104 = arith.constant 0.000000e+00 : f32
    %192 = vector.broadcast %cst_104 : f32 to vector<8x7xf32>
    %193 = tpu.concatenate %191, %192 in 1 : vector<8x57xf32>, vector<8x7xf32> -> vector<8x64xf32>
    %c6_105 = arith.constant 6 : index
    %c0_106 = arith.constant 0 : index
    %c0_107 = arith.constant 0 : index
    %194 = vector.load %arg13[%c6_105, %c0_106, %c0_107] : memref<9x1x64xf32, #tpu.memory_space<vmem>>, vector<1x1x64xf32>
    %195 = vector.shape_cast %194 : vector<1x1x64xf32> to vector<1x64xf32>
    %196 = vector.broadcast %195 : vector<1x64xf32> to vector<8x64xf32>
    %197 = arith.mulf %193, %196 : vector<8x64xf32>
    %198 = vector.extract_strided_slice %151 {offsets = [0, 8], sizes = [8, 56], strides = [1, 1]} : vector<8x64xf32> to vector<8x56xf32>
    %cst_108 = arith.constant 0.000000e+00 : f32
    %199 = vector.broadcast %cst_108 : f32 to vector<8x8xf32>
    %200 = tpu.concatenate %198, %199 in 1 : vector<8x56xf32>, vector<8x8xf32> -> vector<8x64xf32>
    %c7_109 = arith.constant 7 : index
    %c0_110 = arith.constant 0 : index
    %c0_111 = arith.constant 0 : index
    %201 = vector.load %arg13[%c7_109, %c0_110, %c0_111] : memref<9x1x64xf32, #tpu.memory_space<vmem>>, vector<1x1x64xf32>
    %202 = vector.shape_cast %201 : vector<1x1x64xf32> to vector<1x64xf32>
    %203 = vector.broadcast %202 : vector<1x64xf32> to vector<8x64xf32>
    %204 = arith.mulf %200, %203 : vector<8x64xf32>
    %205 = vector.extract_strided_slice %151 {offsets = [0, 9], sizes = [8, 55], strides = [1, 1]} : vector<8x64xf32> to vector<8x55xf32>
    %cst_112 = arith.constant 0.000000e+00 : f32
    %206 = vector.broadcast %cst_112 : f32 to vector<8x9xf32>
    %207 = tpu.concatenate %205, %206 in 1 : vector<8x55xf32>, vector<8x9xf32> -> vector<8x64xf32>
    %c8_113 = arith.constant 8 : index
    %c0_114 = arith.constant 0 : index
    %c0_115 = arith.constant 0 : index
    %208 = vector.load %arg13[%c8_113, %c0_114, %c0_115] : memref<9x1x64xf32, #tpu.memory_space<vmem>>, vector<1x1x64xf32>
    %209 = vector.shape_cast %208 : vector<1x1x64xf32> to vector<1x64xf32>
    %210 = vector.broadcast %209 : vector<1x64xf32> to vector<8x64xf32>
    %211 = arith.mulf %207, %210 : vector<8x64xf32>
    %212 = tpu.concatenate %158, %165, %172, %179, %183, %190, %197, %204, %211 in 0 : vector<8x64xf32>, vector<8x64xf32>, vector<8x64xf32>, vector<8x64xf32>, vector<8x64xf32>, vector<8x64xf32>, vector<8x64xf32>, vector<8x64xf32>, vector<8x64xf32> -> vector<72x64xf32>
    %c0_116 = arith.constant 0 : index
    %c0_117 = arith.constant 0 : index
    %213 = vector.load %arg6[%c0_116, %c0_117] : memref<16x72xf32, #tpu.memory_space<vmem>>, vector<16x72xf32>
    %cst_118 = arith.constant dense<0.000000e+00> : vector<16x64xf32>
    %214 = tpu.matmul %213, %212, %cst_118 {dimension_numbers = #tpu.dot_dimension_numbers<[1], [0], [0], [1], [0, 0, 1, 1], [], []>} : vector<16x72xf32>, vector<72x64xf32>, vector<16x64xf32> -> vector<16x64xf32>
    %c0_119 = arith.constant 0 : index
    %c0_120 = arith.constant 0 : index
    %215 = vector.load %arg7[%c0_119, %c0_120] : memref<16x1xf32, #tpu.memory_space<vmem>>, vector<16x1xf32>
    %216 = vector.broadcast %215 : vector<16x1xf32> to vector<16x64xf32>
    %217 = arith.addf %214, %216 : vector<16x64xf32>
    %cst_121 = arith.constant 0.000000e+00 : f32
    %218 = vector.broadcast %cst_121 : f32 to vector<16x64xf32>
    %219 = arith.maximumf %217, %218 : vector<16x64xf32>
    %cst_122 = arith.constant 0.000000e+00 : f32
    %220 = vector.broadcast %cst_122 : f32 to vector<16x9xf32>
    %221 = vector.extract_strided_slice %219 {offsets = [0, 0], sizes = [16, 55], strides = [1, 1]} : vector<16x64xf32> to vector<16x55xf32>
    %222 = tpu.concatenate %220, %221 in 1 : vector<16x9xf32>, vector<16x55xf32> -> vector<16x64xf32>
    %c0_123 = arith.constant 0 : index
    %c0_124 = arith.constant 0 : index
    %c0_125 = arith.constant 0 : index
    %223 = vector.load %arg13[%c0_123, %c0_124, %c0_125] : memref<9x1x64xf32, #tpu.memory_space<vmem>>, vector<1x1x64xf32>
    %224 = vector.shape_cast %223 : vector<1x1x64xf32> to vector<1x64xf32>
    %225 = vector.broadcast %224 : vector<1x64xf32> to vector<16x64xf32>
    %226 = arith.mulf %222, %225 : vector<16x64xf32>
    %cst_126 = arith.constant 0.000000e+00 : f32
    %227 = vector.broadcast %cst_126 : f32 to vector<16x8xf32>
    %228 = vector.extract_strided_slice %219 {offsets = [0, 0], sizes = [16, 56], strides = [1, 1]} : vector<16x64xf32> to vector<16x56xf32>
    %229 = tpu.concatenate %227, %228 in 1 : vector<16x8xf32>, vector<16x56xf32> -> vector<16x64xf32>
    %c1_127 = arith.constant 1 : index
    %c0_128 = arith.constant 0 : index
    %c0_129 = arith.constant 0 : index
    %230 = vector.load %arg13[%c1_127, %c0_128, %c0_129] : memref<9x1x64xf32, #tpu.memory_space<vmem>>, vector<1x1x64xf32>
    %231 = vector.shape_cast %230 : vector<1x1x64xf32> to vector<1x64xf32>
    %232 = vector.broadcast %231 : vector<1x64xf32> to vector<16x64xf32>
    %233 = arith.mulf %229, %232 : vector<16x64xf32>
    %cst_130 = arith.constant 0.000000e+00 : f32
    %234 = vector.broadcast %cst_130 : f32 to vector<16x7xf32>
    %235 = vector.extract_strided_slice %219 {offsets = [0, 0], sizes = [16, 57], strides = [1, 1]} : vector<16x64xf32> to vector<16x57xf32>
    %236 = tpu.concatenate %234, %235 in 1 : vector<16x7xf32>, vector<16x57xf32> -> vector<16x64xf32>
    %c2_131 = arith.constant 2 : index
    %c0_132 = arith.constant 0 : index
    %c0_133 = arith.constant 0 : index
    %237 = vector.load %arg13[%c2_131, %c0_132, %c0_133] : memref<9x1x64xf32, #tpu.memory_space<vmem>>, vector<1x1x64xf32>
    %238 = vector.shape_cast %237 : vector<1x1x64xf32> to vector<1x64xf32>
    %239 = vector.broadcast %238 : vector<1x64xf32> to vector<16x64xf32>
    %240 = arith.mulf %236, %239 : vector<16x64xf32>
    %cst_134 = arith.constant 0.000000e+00 : f32
    %241 = vector.broadcast %cst_134 : f32 to vector<16x1xf32>
    %242 = vector.extract_strided_slice %219 {offsets = [0, 0], sizes = [16, 63], strides = [1, 1]} : vector<16x64xf32> to vector<16x63xf32>
    %243 = tpu.concatenate %241, %242 in 1 : vector<16x1xf32>, vector<16x63xf32> -> vector<16x64xf32>
    %c3_135 = arith.constant 3 : index
    %c0_136 = arith.constant 0 : index
    %c0_137 = arith.constant 0 : index
    %244 = vector.load %arg13[%c3_135, %c0_136, %c0_137] : memref<9x1x64xf32, #tpu.memory_space<vmem>>, vector<1x1x64xf32>
    %245 = vector.shape_cast %244 : vector<1x1x64xf32> to vector<1x64xf32>
    %246 = vector.broadcast %245 : vector<1x64xf32> to vector<16x64xf32>
    %247 = arith.mulf %243, %246 : vector<16x64xf32>
    %c4_138 = arith.constant 4 : index
    %c0_139 = arith.constant 0 : index
    %c0_140 = arith.constant 0 : index
    %248 = vector.load %arg13[%c4_138, %c0_139, %c0_140] : memref<9x1x64xf32, #tpu.memory_space<vmem>>, vector<1x1x64xf32>
    %249 = vector.shape_cast %248 : vector<1x1x64xf32> to vector<1x64xf32>
    %250 = vector.broadcast %249 : vector<1x64xf32> to vector<16x64xf32>
    %251 = arith.mulf %219, %250 : vector<16x64xf32>
    %252 = vector.extract_strided_slice %219 {offsets = [0, 1], sizes = [16, 63], strides = [1, 1]} : vector<16x64xf32> to vector<16x63xf32>
    %cst_141 = arith.constant 0.000000e+00 : f32
    %253 = vector.broadcast %cst_141 : f32 to vector<16x1xf32>
    %254 = tpu.concatenate %252, %253 in 1 : vector<16x63xf32>, vector<16x1xf32> -> vector<16x64xf32>
    %c5_142 = arith.constant 5 : index
    %c0_143 = arith.constant 0 : index
    %c0_144 = arith.constant 0 : index
    %255 = vector.load %arg13[%c5_142, %c0_143, %c0_144] : memref<9x1x64xf32, #tpu.memory_space<vmem>>, vector<1x1x64xf32>
    %256 = vector.shape_cast %255 : vector<1x1x64xf32> to vector<1x64xf32>
    %257 = vector.broadcast %256 : vector<1x64xf32> to vector<16x64xf32>
    %258 = arith.mulf %254, %257 : vector<16x64xf32>
    %259 = vector.extract_strided_slice %219 {offsets = [0, 7], sizes = [16, 57], strides = [1, 1]} : vector<16x64xf32> to vector<16x57xf32>
    %cst_145 = arith.constant 0.000000e+00 : f32
    %260 = vector.broadcast %cst_145 : f32 to vector<16x7xf32>
    %261 = tpu.concatenate %259, %260 in 1 : vector<16x57xf32>, vector<16x7xf32> -> vector<16x64xf32>
    %c6_146 = arith.constant 6 : index
    %c0_147 = arith.constant 0 : index
    %c0_148 = arith.constant 0 : index
    %262 = vector.load %arg13[%c6_146, %c0_147, %c0_148] : memref<9x1x64xf32, #tpu.memory_space<vmem>>, vector<1x1x64xf32>
    %263 = vector.shape_cast %262 : vector<1x1x64xf32> to vector<1x64xf32>
    %264 = vector.broadcast %263 : vector<1x64xf32> to vector<16x64xf32>
    %265 = arith.mulf %261, %264 : vector<16x64xf32>
    %266 = vector.extract_strided_slice %219 {offsets = [0, 8], sizes = [16, 56], strides = [1, 1]} : vector<16x64xf32> to vector<16x56xf32>
    %cst_149 = arith.constant 0.000000e+00 : f32
    %267 = vector.broadcast %cst_149 : f32 to vector<16x8xf32>
    %268 = tpu.concatenate %266, %267 in 1 : vector<16x56xf32>, vector<16x8xf32> -> vector<16x64xf32>
    %c7_150 = arith.constant 7 : index
    %c0_151 = arith.constant 0 : index
    %c0_152 = arith.constant 0 : index
    %269 = vector.load %arg13[%c7_150, %c0_151, %c0_152] : memref<9x1x64xf32, #tpu.memory_space<vmem>>, vector<1x1x64xf32>
    %270 = vector.shape_cast %269 : vector<1x1x64xf32> to vector<1x64xf32>
    %271 = vector.broadcast %270 : vector<1x64xf32> to vector<16x64xf32>
    %272 = arith.mulf %268, %271 : vector<16x64xf32>
    %273 = vector.extract_strided_slice %219 {offsets = [0, 9], sizes = [16, 55], strides = [1, 1]} : vector<16x64xf32> to vector<16x55xf32>
    %cst_153 = arith.constant 0.000000e+00 : f32
    %274 = vector.broadcast %cst_153 : f32 to vector<16x9xf32>
    %275 = tpu.concatenate %273, %274 in 1 : vector<16x55xf32>, vector<16x9xf32> -> vector<16x64xf32>
    %c8_154 = arith.constant 8 : index
    %c0_155 = arith.constant 0 : index
    %c0_156 = arith.constant 0 : index
    %276 = vector.load %arg13[%c8_154, %c0_155, %c0_156] : memref<9x1x64xf32, #tpu.memory_space<vmem>>, vector<1x1x64xf32>
    %277 = vector.shape_cast %276 : vector<1x1x64xf32> to vector<1x64xf32>
    %278 = vector.broadcast %277 : vector<1x64xf32> to vector<16x64xf32>
    %279 = arith.mulf %275, %278 : vector<16x64xf32>
    %280 = tpu.concatenate %226, %233, %240, %247, %251, %258, %265, %272, %279 in 0 : vector<16x64xf32>, vector<16x64xf32>, vector<16x64xf32>, vector<16x64xf32>, vector<16x64xf32>, vector<16x64xf32>, vector<16x64xf32>, vector<16x64xf32>, vector<16x64xf32> -> vector<144x64xf32>
    %c0_157 = arith.constant 0 : index
    %c0_158 = arith.constant 0 : index
    %281 = vector.load %arg8[%c0_157, %c0_158] : memref<16x144xf32, #tpu.memory_space<vmem>>, vector<16x144xf32>
    %cst_159 = arith.constant dense<0.000000e+00> : vector<16x64xf32>
    %282 = tpu.matmul %281, %280, %cst_159 {dimension_numbers = #tpu.dot_dimension_numbers<[1], [0], [0], [1], [0, 0, 1, 1], [], []>} : vector<16x144xf32>, vector<144x64xf32>, vector<16x64xf32> -> vector<16x64xf32>
    %c0_160 = arith.constant 0 : index
    %c0_161 = arith.constant 0 : index
    %283 = vector.load %arg9[%c0_160, %c0_161] : memref<16x1xf32, #tpu.memory_space<vmem>>, vector<16x1xf32>
    %284 = vector.broadcast %283 : vector<16x1xf32> to vector<16x64xf32>
    %285 = arith.addf %282, %284 : vector<16x64xf32>
    %cst_162 = arith.constant 0.000000e+00 : f32
    %286 = vector.broadcast %cst_162 : f32 to vector<16x64xf32>
    %287 = arith.maximumf %285, %286 : vector<16x64xf32>
    %288 = vector.extract_strided_slice %287 {offsets = [0, 1], sizes = [16, 63], strides = [1, 1]} : vector<16x64xf32> to vector<16x63xf32>
    %cst_163 = arith.constant 0.000000e+00 : f32
    %289 = vector.broadcast %cst_163 : f32 to vector<16x1xf32>
    %290 = tpu.concatenate %288, %289 in 1 : vector<16x63xf32>, vector<16x1xf32> -> vector<16x64xf32>
    %291 = arith.maximumf %287, %290 : vector<16x64xf32>
    %292 = vector.extract_strided_slice %287 {offsets = [0, 8], sizes = [16, 56], strides = [1, 1]} : vector<16x64xf32> to vector<16x56xf32>
    %cst_164 = arith.constant 0.000000e+00 : f32
    %293 = vector.broadcast %cst_164 : f32 to vector<16x8xf32>
    %294 = tpu.concatenate %292, %293 in 1 : vector<16x56xf32>, vector<16x8xf32> -> vector<16x64xf32>
    %295 = vector.extract_strided_slice %287 {offsets = [0, 9], sizes = [16, 55], strides = [1, 1]} : vector<16x64xf32> to vector<16x55xf32>
    %cst_165 = arith.constant 0.000000e+00 : f32
    %296 = vector.broadcast %cst_165 : f32 to vector<16x9xf32>
    %297 = tpu.concatenate %295, %296 in 1 : vector<16x55xf32>, vector<16x9xf32> -> vector<16x64xf32>
    %298 = arith.maximumf %294, %297 : vector<16x64xf32>
    %299 = arith.maximumf %291, %298 : vector<16x64xf32>
    %c0_166 = arith.constant 0 : index
    %c0_167 = arith.constant 0 : index
    %300 = vector.load %arg11[%c0_166, %c0_167] : memref<64x16xf32, #tpu.memory_space<vmem>>, vector<64x16xf32>
    %cst_168 = arith.constant dense<0.000000e+00> : vector<16x16xf32>
    %301 = tpu.matmul %299, %300, %cst_168 {dimension_numbers = #tpu.dot_dimension_numbers<[1], [0], [0], [1], [0, 0, 1, 1], [], []>} : vector<16x64xf32>, vector<64x16xf32>, vector<16x16xf32> -> vector<16x16xf32>
    %302 = vector.extract_strided_slice %301 {offsets = [0, 0], sizes = [1, 16], strides = [1, 1]} : vector<16x16xf32> to vector<1x16xf32>
    %303 = vector.extract_strided_slice %301 {offsets = [1, 0], sizes = [1, 16], strides = [1, 1]} : vector<16x16xf32> to vector<1x16xf32>
    %304 = vector.extract_strided_slice %301 {offsets = [2, 0], sizes = [1, 16], strides = [1, 1]} : vector<16x16xf32> to vector<1x16xf32>
    %305 = vector.extract_strided_slice %301 {offsets = [3, 0], sizes = [1, 16], strides = [1, 1]} : vector<16x16xf32> to vector<1x16xf32>
    %306 = vector.extract_strided_slice %301 {offsets = [4, 0], sizes = [1, 16], strides = [1, 1]} : vector<16x16xf32> to vector<1x16xf32>
    %307 = vector.extract_strided_slice %301 {offsets = [5, 0], sizes = [1, 16], strides = [1, 1]} : vector<16x16xf32> to vector<1x16xf32>
    %308 = vector.extract_strided_slice %301 {offsets = [6, 0], sizes = [1, 16], strides = [1, 1]} : vector<16x16xf32> to vector<1x16xf32>
    %309 = vector.extract_strided_slice %301 {offsets = [7, 0], sizes = [1, 16], strides = [1, 1]} : vector<16x16xf32> to vector<1x16xf32>
    %310 = vector.extract_strided_slice %301 {offsets = [8, 0], sizes = [1, 16], strides = [1, 1]} : vector<16x16xf32> to vector<1x16xf32>
    %311 = vector.extract_strided_slice %301 {offsets = [9, 0], sizes = [1, 16], strides = [1, 1]} : vector<16x16xf32> to vector<1x16xf32>
    %312 = vector.extract_strided_slice %301 {offsets = [10, 0], sizes = [1, 16], strides = [1, 1]} : vector<16x16xf32> to vector<1x16xf32>
    %313 = vector.extract_strided_slice %301 {offsets = [11, 0], sizes = [1, 16], strides = [1, 1]} : vector<16x16xf32> to vector<1x16xf32>
    %314 = vector.extract_strided_slice %301 {offsets = [12, 0], sizes = [1, 16], strides = [1, 1]} : vector<16x16xf32> to vector<1x16xf32>
    %315 = vector.extract_strided_slice %301 {offsets = [13, 0], sizes = [1, 16], strides = [1, 1]} : vector<16x16xf32> to vector<1x16xf32>
    %316 = vector.extract_strided_slice %301 {offsets = [14, 0], sizes = [1, 16], strides = [1, 1]} : vector<16x16xf32> to vector<1x16xf32>
    %317 = vector.extract_strided_slice %301 {offsets = [15, 0], sizes = [1, 16], strides = [1, 1]} : vector<16x16xf32> to vector<1x16xf32>
    %318 = tpu.concatenate %302, %303, %304, %305, %306, %307, %308, %309, %310, %311, %312, %313, %314, %315, %316, %317 in 1 : vector<1x16xf32>, vector<1x16xf32>, vector<1x16xf32>, vector<1x16xf32>, vector<1x16xf32>, vector<1x16xf32>, vector<1x16xf32>, vector<1x16xf32>, vector<1x16xf32>, vector<1x16xf32>, vector<1x16xf32>, vector<1x16xf32>, vector<1x16xf32>, vector<1x16xf32>, vector<1x16xf32>, vector<1x16xf32> -> vector<1x256xf32>
    %c0_169 = arith.constant 0 : index
    %c0_170 = arith.constant 0 : index
    %319 = vector.load %arg14[%c0_169, %c0_170] : memref<256x64xf32, #tpu.memory_space<vmem>>, vector<256x64xf32>
    %cst_171 = arith.constant dense<0.000000e+00> : vector<1x64xf32>
    %320 = tpu.matmul %318, %319, %cst_171 {dimension_numbers = #tpu.dot_dimension_numbers<[1], [0], [0], [1], [0, 0, 1, 1], [], []>} : vector<1x256xf32>, vector<256x64xf32>, vector<1x64xf32> -> vector<1x64xf32>
    %c0_172 = arith.constant 0 : index
    %c0_173 = arith.constant 0 : index
    %321 = vector.load %arg15[%c0_172, %c0_173] : memref<1x64xf32, #tpu.memory_space<vmem>>, vector<1x64xf32>
    %322 = arith.addf %320, %321 : vector<1x64xf32>
    %cst_174 = arith.constant 0.000000e+00 : f32
    %323 = vector.broadcast %cst_174 : f32 to vector<1x64xf32>
    %324 = arith.maximumf %322, %323 : vector<1x64xf32>
    %c0_175 = arith.constant 0 : index
    %c0_176 = arith.constant 0 : index
    %325 = vector.load %arg16[%c0_175, %c0_176] : memref<64x64xf32, #tpu.memory_space<vmem>>, vector<64x64xf32>
    %cst_177 = arith.constant dense<0.000000e+00> : vector<1x64xf32>
    %326 = tpu.matmul %324, %325, %cst_177 {dimension_numbers = #tpu.dot_dimension_numbers<[1], [0], [0], [1], [0, 0, 1, 1], [], []>} : vector<1x64xf32>, vector<64x64xf32>, vector<1x64xf32> -> vector<1x64xf32>
    %c0_178 = arith.constant 0 : index
    %c0_179 = arith.constant 0 : index
    %327 = vector.load %arg17[%c0_178, %c0_179] : memref<1x64xf32, #tpu.memory_space<vmem>>, vector<1x64xf32>
    %328 = arith.addf %326, %327 : vector<1x64xf32>
    %cst_180 = arith.constant 0.000000e+00 : f32
    %329 = vector.broadcast %cst_180 : f32 to vector<1x64xf32>
    %330 = arith.maximumf %328, %329 : vector<1x64xf32>
    %c0_181 = arith.constant 0 : index
    %c0_182 = arith.constant 0 : index
    %331 = vector.load %arg18[%c0_181, %c0_182] : memref<64x128xf32, #tpu.memory_space<vmem>>, vector<64x128xf32>
    %cst_183 = arith.constant dense<0.000000e+00> : vector<1x128xf32>
    %332 = tpu.matmul %330, %331, %cst_183 {dimension_numbers = #tpu.dot_dimension_numbers<[1], [0], [0], [1], [0, 0, 1, 1], [], []>} : vector<1x64xf32>, vector<64x128xf32>, vector<1x128xf32> -> vector<1x128xf32>
    %c0_184 = arith.constant 0 : index
    %c0_185 = arith.constant 0 : index
    %333 = vector.load %arg19[%c0_184, %c0_185] : memref<1x128xf32, #tpu.memory_space<vmem>>, vector<1x128xf32>
    %334 = arith.addf %332, %333 : vector<1x128xf32>
    %c0_186 = arith.constant 0 : index
    %c0_187 = arith.constant 0 : index
    %c0_188 = arith.constant 0 : index
    %335 = vector.load %arg20[%c0_186, %c0_187, %c0_188] : memref<1x1x128xf32, #tpu.memory_space<vmem>>, vector<1x1x128xf32>
    %336 = vector.shape_cast %335 : vector<1x1x128xf32> to vector<1x128xf32>
    %337 = vector.shape_cast %334 : vector<1x128xf32> to vector<1x1x128xf32>
    tpu.vector_store %arg20[%c0_186, %c0_187, %c0_188], %337 {strides = array<i32>} : memref<1x1x128xf32, #tpu.memory_space<vmem>>, vector<1x1x128xf32>,
    return
  }
  func.func @transform_0(%arg0: i32) -> (i32, i32, i32) {
    %c0_i32 = arith.constant 0 : i32
    %c0_i32_0 = arith.constant 0 : i32
    %c0_i32_1 = arith.constant 0 : i32
    return %arg0, %c0_i32, %c0_i32_0 : i32, i32, i32
  }
  func.func @transform_1(%arg0: i32) -> (i32, i32) {
    %c0_i32 = arith.constant 0 : i32
    %c0_i32_0 = arith.constant 0 : i32
    %c0_i32_1 = arith.constant 0 : i32
    return %c0_i32, %c0_i32_0 : i32, i32
  }
  func.func @transform_2(%arg0: i32) -> (i32, i32) {
    %c0_i32 = arith.constant 0 : i32
    %c0_i32_0 = arith.constant 0 : i32
    %c0_i32_1 = arith.constant 0 : i32
    return %c0_i32, %c0_i32_0 : i32, i32
  }
  func.func @transform_3(%arg0: i32) -> (i32, i32) {
    %c0_i32 = arith.constant 0 : i32
    %c0_i32_0 = arith.constant 0 : i32
    %c0_i32_1 = arith.constant 0 : i32
    return %c0_i32, %c0_i32_0 : i32, i32
  }
  func.func @transform_4(%arg0: i32) -> (i32, i32) {
    %c0_i32 = arith.constant 0 : i32
    %c0_i32_0 = arith.constant 0 : i32
    %c0_i32_1 = arith.constant 0 : i32
    return %c0_i32, %c0_i32_0 : i32, i32
  }
  func.func @transform_5(%arg0: i32) -> (i32, i32) {
    %c0_i32 = arith.constant 0 : i32
    %c0_i32_0 = arith.constant 0 : i32
    %c0_i32_1 = arith.constant 0 : i32
    return %c0_i32, %c0_i32_0 : i32, i32
  }
  func.func @transform_6(%arg0: i32) -> (i32, i32) {
    %c0_i32 = arith.constant 0 : i32
    %c0_i32_0 = arith.constant 0 : i32
    %c0_i32_1 = arith.constant 0 : i32
    return %c0_i32, %c0_i32_0 : i32, i32
  }
  func.func @transform_7(%arg0: i32) -> (i32, i32) {
    %c0_i32 = arith.constant 0 : i32
    %c0_i32_0 = arith.constant 0 : i32
    %c0_i32_1 = arith.constant 0 : i32
    return %c0_i32, %c0_i32_0 : i32, i32
  }
  func.func @transform_8(%arg0: i32) -> (i32, i32) {
    %c0_i32 = arith.constant 0 : i32
    %c0_i32_0 = arith.constant 0 : i32
    %c0_i32_1 = arith.constant 0 : i32
    return %c0_i32, %c0_i32_0 : i32, i32
  }
  func.func @transform_9(%arg0: i32) -> (i32, i32) {
    %c0_i32 = arith.constant 0 : i32
    %c0_i32_0 = arith.constant 0 : i32
    %c0_i32_1 = arith.constant 0 : i32
    return %c0_i32, %c0_i32_0 : i32, i32
  }
  func.func @transform_10(%arg0: i32) -> (i32, i32) {
    %c0_i32 = arith.constant 0 : i32
    %c0_i32_0 = arith.constant 0 : i32
    %c0_i32_1 = arith.constant 0 : i32
    return %c0_i32, %c0_i32_0 : i32, i32
  }
  func.func @transform_11(%arg0: i32) -> (i32, i32, i32) {
    %c0_i32 = arith.constant 0 : i32
    %c0_i32_0 = arith.constant 0 : i32
    %c0_i32_1 = arith.constant 0 : i32
    %c0_i32_2 = arith.constant 0 : i32
    return %c0_i32, %c0_i32_0, %c0_i32_1 : i32, i32, i32
  }
  func.func @transform_12(%arg0: i32) -> (i32, i32, i32) {
    %c0_i32 = arith.constant 0 : i32
    %c0_i32_0 = arith.constant 0 : i32
    %c0_i32_1 = arith.constant 0 : i32
    %c0_i32_2 = arith.constant 0 : i32
    return %c0_i32, %c0_i32_0, %c0_i32_1 : i32, i32, i32
  }
  func.func @transform_13(%arg0: i32) -> (i32, i32) {
    %c0_i32 = arith.constant 0 : i32
    %c0_i32_0 = arith.constant 0 : i32
    %c0_i32_1 = arith.constant 0 : i32
    return %c0_i32, %c0_i32_0 : i32, i32
  }
  func.func @transform_14(%arg0: i32) -> (i32, i32) {
    %c0_i32 = arith.constant 0 : i32
    %c0_i32_0 = arith.constant 0 : i32
    %c0_i32_1 = arith.constant 0 : i32
    return %c0_i32, %c0_i32_0 : i32, i32
  }
  func.func @transform_15(%arg0: i32) -> (i32, i32) {
    %c0_i32 = arith.constant 0 : i32
    %c0_i32_0 = arith.constant 0 : i32
    %c0_i32_1 = arith.constant 0 : i32
    return %c0_i32, %c0_i32_0 : i32, i32
  }
  func.func @transform_16(%arg0: i32) -> (i32, i32) {
    %c0_i32 = arith.constant 0 : i32
    %c0_i32_0 = arith.constant 0 : i32
    %c0_i32_1 = arith.constant 0 : i32
    return %c0_i32, %c0_i32_0 : i32, i32
  }
  func.func @transform_17(%arg0: i32) -> (i32, i32) {
    %c0_i32 = arith.constant 0 : i32
    %c0_i32_0 = arith.constant 0 : i32
    %c0_i32_1 = arith.constant 0 : i32
    return %c0_i32, %c0_i32_0 : i32, i32
  }
  func.func @transform_18(%arg0: i32) -> (i32, i32) {
    %c0_i32 = arith.constant 0 : i32
    %c0_i32_0 = arith.constant 0 : i32
    %c0_i32_1 = arith.constant 0 : i32
    return %c0_i32, %c0_i32_0 : i32, i32
  }
  func.func @transform_19(%arg0: i32) -> (i32, i32, i32) {
    %c0_i32 = arith.constant 0 : i32
    %c0_i32_0 = arith.constant 0 : i32
    %c0_i32_1 = arith.constant 0 : i32
    return %arg0, %c0_i32, %c0_i32_0 : i32, i32, i32
  }
}

</mosaic_0001>

<bundles_post_ra>
// kernel: vgg_forward.1
= control target key start
LH: loop header
LB: loop body
LE: loop exit
PB: predicated region body
PF: predicated region fallthrough
CT: control target
= control target key end

     0   :  { %s3493_s0 = inlined_call_operand.vmem [shape: f32[2,8,256], index: 0, kind: input, shape index: {}]   ;;  %s3494_s1 = inlined_call_operand.vmem [shape: f32[8,72], index: 1, kind: input, shape index: {}]   ;;  %s3495_s2 = inlined_call_operand.vmem [shape: f32[8,1], index: 2, kind: input, shape index: {}]   ;;  %s3496_s3 = inlined_call_operand.vmem [shape: f32[8,72], index: 3, kind: input, shape index: {}]   ;;  %s3497_s4 = inlined_call_operand.vmem [shape: f32[8,1], index: 4, kind: input, shape index: {}]   ;;  %s3498_s5 = inlined_call_operand.vmem [shape: f32[16,72], index: 5, kind: input, shape index: {}]   ;;  %s3499_s6 = inlined_call_operand.vmem [shape: f32[16,1], index: 6, kind: input, shape index: {}]   ;;  %s3500_s7 = inlined_call_operand.vmem [shape: f32[16,144], index: 7, kind: input, shape index: {}]   ;;  %s3501_s8 = inlined_call_operand.vmem [shape: f32[16,1], index: 8, kind: input, shape index: {}]   ;;  %s3502_s9 = inlined_call_operand.vmem [shape: f32[256,64], index: 9, kind: input, shape index: {}]   ;;  %s3503_s10 = inlined_call_operand.vmem [shape: f32[64,16], index: 10, kind: input, shape index: {}]   ;;  %s3504_s11 = inlined_call_operand.vmem [shape: f32[9,1,256], index: 11, kind: input, shape index: {}]   ;;  %s3505_s12 = inlined_call_operand.vmem [shape: f32[9,1,64], index: 12, kind: input, shape index: {}]   ;;  %s3506_s13 = inlined_call_operand.vmem [shape: f32[256,64], index: 13, kind: input, shape index: {}]   ;;  %s3507_s14 = inlined_call_operand.vmem [shape: f32[1,64], index: 14, kind: input, shape index: {}]   ;;  %s3508_s15 = inlined_call_operand.vmem [shape: f32[64,64], index: 15, kind: input, shape index: {}]   ;;  %s3509_s16 = inlined_call_operand.vmem [shape: f32[1,64], index: 16, kind: input, shape index: {}]   ;;  %s3510_s17 = inlined_call_operand.vmem [shape: f32[64,128], index: 17, kind: input, shape index: {}]   ;;  %s3511_s18 = inlined_call_operand.vmem [shape: f32[1,128], index: 18, kind: input, shape index: {}]   ;;  %s3512_s19 = inlined_call_operand.hbm [shape: f32[2,1,128], index: 19, kind: output, shape index: {}]  }
   0x1   :  { %3543 = sst [smem:[#allocation11_spill]] %s3493_s0 }
   0x2   :  { %3544 = sst [smem:[#allocation12_spill]] %s3494_s1 }
   0x3   :  { %3545 = sst [smem:[#allocation13_spill]] %s3495_s2 }
   0x4   :  { %3546 = sst [smem:[#allocation14_spill]] %s3496_s3 }
   0x5   :  { %3547 = sst [smem:[#allocation15_spill]] %s3497_s4 }
   0x6   :  { %3548 = sst [smem:[#allocation16_spill]] %s3504_s11 }
   0x7   :  { %24 = vsyncpa [#allocation3], 0 }
   0x8   :  { %26 = vsyncpa [#allocation3 + $0x1], 0  ;;  %s2661_s0 = smov 0   ;;  %s2663_s30 = smov 0  }
   0x9   :  { %s2665_s20 = smov 0   ;;  %s2667_s21 = smov 0  }
   0xa LB: > { %3549 = sst [smem:[#allocation5_spill]] %s2524_s0  ;;  %s2682_s1 = sadd.s32 4294967295, %s2536_s21   ;;  %s2536_s21 = sphi %s2667_s21, %s3578_s21   ;;  %s2532_s20 = sphi %s2665_s20, %s3580_s20   ;;  %s2528_s30 = sphi %s2663_s30, %s3582_s30   ;;  %s2524_s0 = sphi %s2661_s0, %s3581_s0  }
   0xb   : > { %3550 = sst [smem:[#allocation6_spill]] %s2532_s20  ;;  %s2131_s22 = sadd.s32 4294967294, %s2536_s21  }
   0xc   : > { %3551 = sst [smem:[#allocation7_spill]] %s2536_s21  ;;  %s2686_s2 = sadd.s32 1, %s2536_s21  }
   0xd   : > { %3552 = sst [smem:[#allocation8_spill]] %s2686_s2  ;;  %s443_s23 = sadd.s32 1, %s2532_s20 }
   0xe   : > { %s440_s24 = ssub.s32 %s2536_s21, %s2686_s2  ;;  %p453_p0 = scmp.ne.s32.totalorder %s2532_s20, %s2528_s30 }
   0xf   : > { %p441_p1 = scmp.eq.s32.totalorder %s440_s24, 0  ;;  %p454_p2 = scmp.eq.s32.totalorder %s2682_s1, 1 }
  0x10   : > { %p459_p3 = scmp.ne.s32.totalorder %s2528_s30, %s2524_s0  ;;  %p460_p4 = scmp.eq.s32.totalorder %s2131_s22, 1 }
  0x11   : > { %s2697_s25 = scalar_select %p441_p1, %s2532_s20, %s443_s23  }
  0x12   : > { %p2699_p5 = por %p454_p2, %p453_p0  ;;  %p2703_p6 = por %p460_p4, %p459_p3 }
  0x13   : > { %3553 = sst [smem:[#allocation9_spill]] %s2697_s25  ;;  %p2134_p7 = scmp.ge.s32.totalorder %s2536_s21, 1 }
  0x14   : > { %s3555_s26 = scalar_select %p2703_p6, 1, 0 }
  0x15   : > { %p540_p8 = scmp.lt.s32.totalorder %s2536_s21, 3 }
  0x16   : > { %3556 = sst [smem:[#allocation10_spill]] %s3555_s26 }
  0x17   : > { %p541_p9 = pnand %p2134_p7, %p540_p8 }
  0x18   : > { %p595_p10 = scmp.lt.s32.totalorder (!%p541_p9), %s2682_s1, 1  ;;  %s3557_s23 = sld [smem:[#allocation11_spill]] (!%p541_p9) }
  0x19   : > { %544 = sbr.rel (%p541_p9) target bundleno = 2804 (0xaf4), region = 96  ;;  %s3520_s25 = smov (!%p541_p9), 112  }
  0x1a   : > { %s3522_s20 = smov (!%p541_p9), 111   ;;  %s3530_s29 = smov (!%p541_p9), 1  }
  0x1b   : > { %s3518_s22 = smov (!%p541_p9), 15   ;;  %s3559_s11 = sld [smem:[#allocation16_spill]] (!%p541_p9) }
  0x1c   : > { %s3568_s4 = sld [smem:[#allocation15_spill]] (!%p541_p9)  ;;  %s3535_s0 = smov (!%p541_p9), 119  }
  0x1d   : > { %s2550_s26 = smov (!%p541_p9), 121   ;;  %s3537_s2 = smov (!%p541_p9), 7  }
  0x1e   : > { %s596_s27 = scalar_select %p595_p10, %s2682_s1, 1  ;;  %v2543_v2 = vmov 0.0   ;;  %v2545_v3 = vmov 0   ;;  %v615_v5 = vlaneseq  ;;  %vm790_vm0 = vcmask 908288  }
  0x1f   : > { %885 = vmatprep.mubr.f32.mxu0 %v2543_v2  ;;  %1052 = vmatprep.mubr.f32.mxu1 %v2543_v2  ;;  %vm766_vm1 = vcmask 916480   ;;  %vm742_vm2 = vcmask 924672   ;;  %vm718_vm3 = vcmask 1039360   ;;  %vm679_vm4 = vcmask 7168   ;;  %s2555_s21 = smov 64  }
  0x20   : > { %s2175_s28 = sshll.u32 %s596_s27, 4  ;;  %s3516_s27 = smov 113   ;;  %2424 = vset.pattern.permute.xlu0 %v2545_v3  ;;  %2440 = vset.pattern.permute.xlu1 %v2545_v3  ;;  %v616_v6 = vshrl.u32 %v615_v5, 7  ;;  %vm655_vm5 = vcmask 121856   ;;  %vm631_vm6 = vcmask 130048   ;;  %vm608_vm7 = vcmask 138240  }
  0x21   : > { %s599_s24 = scalar_lea.vmem %s3557_s23, %s2175_s28  ;;  %s3514_s28 = smov 127   ;;  %v2144_v8 = vld [vmem:[%s3559_s11 + $0x10] sm:$0x3]  ;;  %v2143_v11 = vld [vmem:[%s3559_s11 + $0xe] sm:$0x3]  ;;  %vm817_vm8 = vcmask 588800  }
  0x22   : > { %v2714_v0 = vld [vmem:[%s599_s24 + $0x8] sm:$0xff]  ;;  %v2720_v1 = vld [vmem:[%s599_s24] sm:$0xff]  ;;  %s3526_s23 = smov 16   ;;  %s3524_s24 = smov 17   ;;  %v2755_v7 = vsub.s32 1, %v616_v6  ;;  %v2763_v10 = vsub.s32 0, %v616_v6 }
  0x23   : > { %764 = vrot.lane.b32.xlu1 %v2714_v0, %s3520_s25  ;;  %788 = vrot.lane.b32.xlu0 %v2714_v0, %s3522_s20  ;;  %v2142_v18 = vld [vmem:[%s3559_s11 + $0xc] sm:$0x3]  ;;  %v2141_v28 = vld [vmem:[%s3559_s11 + $0xa] sm:$0x3]  ;;  %vm1290_vm9 = vcmask 457728   ;;  %vm1304_vm10 = vcmask 449536  }
  0x24   : > { %v2761_v9 = vrot.slane %v2144_v8, %v2755_v7  ;;  %v2771_v16 = vrot.slane %v2144_v8, %v2763_v10  ;;  %v2774_v17 = vrot.slane %v2143_v11, %v2755_v7  ;;  %v2781_v20 = vrot.slane %v2143_v11, %v2763_v10  ;;  %v2140_v30 = vld [vmem:[%s3559_s11 + $0x8] sm:$0x3]  ;;  %v2139_v40 = vld [vmem:[%s3559_s11 + $0x6] sm:$0x3]  ;;  %v2138_v53 = vld [vmem:[%s3559_s11 + $0x4] sm:$0x3] }
  0x25   : > { %v2787_v26 = vrot.slane %v2142_v18, %v2763_v10  ;;  %v2790_v27 = vrot.slane %v2142_v18, %v2755_v7  ;;  %v2803_v36 = vrot.slane %v2141_v28, %v2763_v10  ;;  %v2808_v39 = vrot.slane %v2141_v28, %v2755_v7  ;;  %v2137_v62 = vld [vmem:[%s3559_s11 + $0x2] sm:$0x3]  ;;  %v613_v11 = vld [vmem:[%s3559_s11] sm:$0x3]  ;;  %s2556_s11 = smov 48  }
  0x26   : > { %v2814_v41 = vrot.slane %v2140_v30, %v2755_v7  ;;  %v2817_v42 = vrot.slane %v2140_v30, %v2763_v10  ;;  %v2822_v47 = vrot.slane %v2139_v40, %v2763_v10  ;;  %v2827_v50 = vrot.slane %v2139_v40, %v2755_v7 }
  0x27   : > { %762 = vrot.lane.b32.xlu1 %v2720_v1, %s3520_s25  ;;  %786 = vrot.lane.b32.xlu0 %v2720_v1, %s3522_s20  ;;  %v2841_v60 = vrot.slane %v2138_v53, %v2763_v10  ;;  %v2844_v61 = vrot.slane %v2138_v53, %v2755_v7  ;;  %v2854_v6 = vrot.slane %v2137_v62, %v2763_v10  ;;  %s3565_s20 = smov 15   ;;  %s3566_s25 = smov 16   ;;  %vm1262_vm11 = vcmask 515072  }
  0x28   : > { %v713_v51 = vmul.f32 %v2814_v41, %v2714_v0  ;;  %v712_v52 = vmul.f32 %v2817_v42, %v2720_v1  ;;  %v2857_v8 = vrot.slane %v2137_v62, %v2755_v7  ;;  %vm1276_vm12 = vcmask 465920  }
  0x29   : > { %vm1226_vm13 = vcmask 56320   ;;  %vm1212_vm14 = vcmask 64512   ;;  %vm1199_vm15 = vcmask 72704  }
  0x2b   : > { %738 = vrot.lane.b32.xlu1 %v2720_v1, %s3516_s27  ;;  %740 = vrot.lane.b32.xlu0 %v2714_v0, %s3516_s27  ;;  %s3560_s27 = sld [smem:[#allocation12_spill]] }
  0x2f   : > { %714 = vrot.lane.b32.xlu1 %v2720_v1, %s3514_s28  ;;  %716 = vrot.lane.b32.xlu0 %v2714_v0, %s3514_s28  ;;  %s3561_s28 = smov 111  }
  0x33   : > { %677 = vrot.lane.b32.xlu1 %v2714_v0, %s3530_s29  ;;  %675 = vrot.lane.b32.xlu0 %v2720_v1, %s3530_s29 }
  0x37   : > { %653 = vrot.lane.b32.xlu1 %v2714_v0, %s3518_s22  ;;  %651 = vrot.lane.b32.xlu0 %v2720_v1, %s3518_s22  ;;  %s3558_s22 = sld [smem:[#allocation13_spill]] }
  0x3b   : > { %629 = vrot.lane.b32.xlu1 %v2714_v0, %s3526_s23  ;;  %627 = vrot.lane.b32.xlu0 %v2720_v1, %s3526_s23  ;;  %s3563_s23 = smov 113  }
  0x3d   : > { %v811_v4 = vld [vmem:[%s3558_s22] sm:$0xff]  ;;  %s3562_s22 = smov 112  }
  0x3f   : > { %606 = vrot.lane.b32.xlu1 %v2714_v0, %s3524_s24  ;;  %604 = vrot.lane.b32.xlu0 %v2720_v1, %s3524_s24  ;;  %s3564_s24 = smov 127  }
  0x43   : > { %814 = vperm.xlu0 %2424, %v811_v4  }
  0x95   : > { %v765_v12 = vpop.permute.xlu1 %764  ;;  %v789_v13 = vpop.permute.xlu0 %788 }
  0x96   : > { %v794_v14 = vsel %vm790_vm0, %v789_v13, 0.0  ;;  %v770_v19 = vsel %vm766_vm1, %v765_v12, 0.0 }
  0x97   : > { %v809_v15 = vmul.f32 %v2761_v9, %v794_v14  ;;  %v785_v29 = vmul.f32 %v2774_v17, %v770_v19 }
  0x99   : > { %835 = vmatprep.subr.mxu0 %v809_v15  ;;  %v763_v21 = vpop.permute.xlu1 %762  ;;  %v787_v22 = vpop.permute.xlu0 %786 }
  0x9a   : > { %v767_v23 = vsel %vm766_vm1, %v763_v21, %v765_v12  ;;  %v791_v24 = vsel %vm790_vm0, %v787_v22, %v789_v13  ;;  %v2867_v21 = vrot.slane %v613_v11, %v2763_v10  ;;  %v2870_v22 = vrot.slane %v613_v11, %v2755_v7  ;;  %v810_v10 = vld [vmem:[%s3560_s27] sm:$0xff]  ;;  %s3567_s27 = smov 17  }
  0x9b   : > { %v808_v25 = vmul.f32 %v2771_v16, %v791_v24  ;;  %v784_v31 = vmul.f32 %v2781_v20, %v767_v23 }
  0x9d   : > { %v739_v32 = vpop.permute.xlu1 %738  ;;  %836 = vmatpush1.msra.mxu0 %v808_v25  ;;  %v741_v33 = vpop.permute.xlu0 %740 }
  0x9e   : > { %v743_v34 = vsel %vm742_vm2, %v739_v32, %v741_v33  ;;  %v746_v35 = vsel %vm742_vm2, %v741_v33, 0.0  ;;  %837 = vmatprep.subr.mxu0 %v785_v29 }
  0x9f   : > { %v760_v37 = vmul.f32 %v2787_v26, %v743_v34  ;;  %v761_v38 = vmul.f32 %v2790_v27, %v746_v35  ;;  %838 = vmatpush1.msra.mxu0 %v784_v31 }
  0xa1   : > { %v715_v43 = vpop.permute.xlu1 %714  ;;  %839 = vmatprep.subr.mxu0 %v761_v38  ;;  %v717_v44 = vpop.permute.xlu0 %716  ;;  %v979_v38 = vld [vmem:[%s3568_s4] sm:$0xff]  ;;  %s3572_s4 = smov 8  }
  0xa2   : > { %v719_v45 = vsel %vm718_vm3, %v715_v43, %v717_v44  ;;  %v722_v46 = vsel %vm718_vm3, %v717_v44, 0.0  ;;  %840 = vmatpush1.msra.mxu0 %v760_v37 }
  0xa3   : > { %v736_v48 = vmul.f32 %v2803_v36, %v719_v45  ;;  %v737_v49 = vmul.f32 %v2808_v39, %v722_v46 }
  0xa5   : > { %v678_v54 = vpop.permute.xlu1 %677  ;;  %841 = vmatprep.subr.mxu0 %v737_v49  ;;  %v676_v55 = vpop.permute.xlu0 %675 }
  0xa6   : > { %v680_v56 = vsel %vm679_vm4, %v676_v55, %v678_v54  ;;  %v683_v57 = vsel %vm679_vm4, 0.0, %v676_v55  ;;  %842 = vmatpush1.msra.mxu0 %v736_v48 }
  0xa7   : > { %v697_v58 = vmul.f32 %v2822_v47, %v683_v57  ;;  %v698_v59 = vmul.f32 %v2827_v50, %v680_v56  ;;  %843 = vmatprep.subr.mxu0 %v713_v51 }
  0xa8   : > { %844 = vmatpush1.msra.mxu0 %v712_v52 }
  0xa9   : > { %v654_v63 = vpop.permute.xlu1 %653  ;;  %v652_v0 = vpop.permute.xlu0 %651  ;;  %845 = vmatprep.subr.mxu0 %v698_v59 }
  0xaa   : > { %v656_v1 = vsel %vm655_vm5, %v652_v0, %v654_v63  ;;  %v659_v3 = vsel %vm655_vm5, 0.0, %v652_v0  ;;  %846 = vmatpush1.msra.mxu0 %v697_v58 }
  0xab   : > { %v673_v4 = vmul.f32 %v2841_v60, %v659_v3  ;;  %v674_v5 = vmul.f32 %v2844_v61, %v656_v1 }
  0xad   : > { %v630_v12 = vpop.permute.xlu1 %629  ;;  %v628_v13 = vpop.permute.xlu0 %627  ;;  %847 = vmatprep.subr.mxu0 %v674_v5 }
  0xae   : > { %v632_v14 = vsel %vm631_vm6, %v628_v13, %v630_v12  ;;  %v635_v15 = vsel %vm631_vm6, 0.0, %v628_v13  ;;  %848 = vmatpush1.msra.mxu0 %v673_v4 }
  0xaf   : > { %v649_v18 = vmul.f32 %v2854_v6, %v635_v15  ;;  %v650_v19 = vmul.f32 %v2857_v8, %v632_v14 }
  0xb1   : > { %v607_v23 = vpop.permute.xlu1 %606  ;;  %v605_v24 = vpop.permute.xlu0 %604  ;;  %849 = vmatprep.subr.mxu0 %v650_v19 }
  0xb2   : > { %v609_v25 = vsel %vm608_vm7, %v605_v24, %v607_v23  ;;  %v612_v28 = vsel %vm608_vm7, 0.0, %v605_v24  ;;  %850 = vmatpush1.msra.mxu0 %v649_v18 }
  0xb3   : > { %v625_v29 = vmul.f32 %v2867_v21, %v612_v28  ;;  %v626_v30 = vmul.f32 %v2870_v22, %v609_v25 }
  0xb5   : > { %851 = vmatprep.subr.mxu0 %v626_v30 }
  0xb6   : > { %852 = vmatpush1.msra.mxu0 %v625_v29 }
  0xb7   : > { %2145 = vmatmul.mubr.msk.f32.vlgmr.msra.gmra.mxu0 %vm817_vm8, %v810_v10 }
  0xbe   : > { %v815_v7 = vpop.permute.xlu0 %814 }
 0x177   : > { %v887_v31 = vpop.f32.mrf.mxu0 }
 0x178   : > { %v888_v32 = vadd.f32 %v887_v31, %v815_v7  ;;  %v1106_v31 = vld [vmem:[%s3502_s9 + $0x68] sm:$0xff] }
 0x179   : > { %v889_v33 = vpop.f32.mrf.mxu0 }
 0x17a   : > { %v892_v34 = vmax.f32 %v888_v32, 0.0  ;;  %v890_v35 = vadd.f32 %v889_v33, %v815_v7  ;;  %v1122_v7 = vld [vmem:[%s3502_s9 + $0xe8] sm:$0xff]  ;;  %v1121_v32 = vld [vmem:[%s3502_s9 + $0xe0] sm:$0xff] }
 0x17b   : > { %v1105_v33 = vld [vmem:[%s3502_s9 + $0x60] sm:$0xff] }
 0x17c   : > { %926 = vrot.lane.b32.xlu0 %v892_v34, %s3530_s29  ;;  %968 = vrot.lane.b32.xlu1 %v892_v34, %s3561_s28  ;;  %v893_v37 = vmax.f32 %v890_v35, 0.0  ;;  %v1104_v35 = vld [vmem:[%s3502_s9 + $0x58] sm:$0xff] }
 0x180   : > { %960 = vrot.lane.b32.xlu0 %v893_v37, %s3562_s22  ;;  %958 = vrot.lane.b32.xlu1 %v892_v34, %s3562_s22 }
 0x184   : > { %950 = vrot.lane.b32.xlu0 %v893_v37, %s3563_s23  ;;  %948 = vrot.lane.b32.xlu1 %v892_v34, %s3563_s23  ;;  %s3569_s23 = sld [smem:[#allocation14_spill]] }
 0x188   : > { %940 = vrot.lane.b32.xlu0 %v893_v37, %s3564_s24  ;;  %938 = vrot.lane.b32.xlu1 %v892_v34, %s3564_s24 }
 0x18c   : > { %916 = vrot.lane.b32.xlu0 %v892_v34, %s3565_s20  ;;  %970 = vrot.lane.b32.xlu1 %v893_v37, %s3561_s28 }
 0x190   : > { %906 = vrot.lane.b32.xlu0 %v892_v34, %s3566_s25  ;;  %928 = vrot.lane.b32.xlu1 %v893_v37, %s3530_s29  ;;  %s2172_s29 = sshll.u32 %s2682_s1, 4 }
 0x194   : > { %896 = vrot.lane.b32.xlu0 %v892_v34, %s3567_s27  ;;  %918 = vrot.lane.b32.xlu1 %v893_v37, %s3565_s20  ;;  %s3539_s20 = smov 9  }
 0x198   : > { %982 = vperm.xlu0 %2424, %v979_v38   ;;  %908 = vrot.lane.b32.xlu1 %v893_v37, %s3566_s25  ;;  %v1103_v38 = vld [vmem:[%s3502_s9 + $0x50] sm:$0xff] }
 0x19c   : > { %898 = vrot.lane.b32.xlu1 %v893_v37, %s3567_s27  ;;  %s3541_s27 = smov 8  }
 0x1ee   : > { %v927_v40 = vpop.permute.xlu0 %926  ;;  %v969_v43 = vpop.permute.xlu1 %968 }
 0x1ef   : > { %v933_v14 = vsel %vm679_vm4, 0.0, %v927_v40 }
 0x1f2   : > { %v961_v44 = vpop.permute.xlu0 %960  ;;  %v959_v45 = vpop.permute.xlu1 %958 }
 0x1f3   : > { %v965_v53 = vsel %vm766_vm1, %v961_v44, 0.0  ;;  %v962_v57 = vsel %vm766_vm1, %v959_v45, %v961_v44  ;;  %v1117_v44 = vld [vmem:[%s3502_s9 + $0xc0] sm:$0xff] }
 0x1f4   : > { %v967_v63 = vmul.f32 %v965_v53, %v2774_v17  ;;  %v966_v3 = vmul.f32 %v962_v57, %v2781_v20  ;;  %v1101_v45 = vld [vmem:[%s3502_s9 + $0x40] sm:$0xff]  ;;  %v1098_v53 = vld [vmem:[%s3502_s9 + $0x28] sm:$0xff] }
 0x1f6   : > { %v951_v46 = vpop.permute.xlu0 %950  ;;  %v949_v48 = vpop.permute.xlu1 %948 }
 0x1f7   : > { %v955_v62 = vsel %vm742_vm2, %v951_v46, 0.0  ;;  %v952_v0 = vsel %vm742_vm2, %v949_v48, %v951_v46  ;;  %v1116_v46 = vld [vmem:[%s3502_s9 + $0xb8] sm:$0xff]  ;;  %vm1776_vm2 = vcmask 261120  }
 0x1f8   : > { %v957_v5 = vmul.f32 %v955_v62, %v2790_v27  ;;  %v937_v27 = vmul.f32 %v893_v37, %v2814_v41  ;;  %v1119_v37 = vld [vmem:[%s3502_s9 + $0xd0] sm:$0xff]  ;;  %v1100_v48 = vld [vmem:[%s3502_s9 + $0x38] sm:$0xff] }
 0x1fa   : > { %v941_v49 = vpop.permute.xlu0 %940  ;;  %v939_v51 = vpop.permute.xlu1 %938 }
 0x1fb   : > { %v945_v4 = vsel %vm718_vm3, %v941_v49, 0.0  ;;  %v942_v11 = vsel %vm718_vm3, %v939_v51, %v941_v49  ;;  %v1115_v49 = vld [vmem:[%s3502_s9 + $0xb0] sm:$0xff] }
 0x1fc   : > { %v947_v17 = vmul.f32 %v945_v4, %v2808_v39  ;;  %v946_v13 = vmul.f32 %v942_v11, %v2803_v36  ;;  %v934_v36 = vmul.f32 %v933_v14, %v2822_v47  ;;  %v1099_v51 = vld [vmem:[%s3502_s9 + $0x30] sm:$0xff]  ;;  %v1110_v4 = vld [vmem:[%s3502_s9 + $0x88] sm:$0xff]  ;;  %v1109_v11 = vld [vmem:[%s3502_s9 + $0x80] sm:$0xff] }
 0x1fe   : > { %v971_v52 = vpop.permute.xlu1 %970  ;;  %v917_v54 = vpop.permute.xlu0 %916 }
 0x1ff   : > { %v972_v55 = vsel %vm790_vm0, %v969_v43, %v971_v52  ;;  %v975_v56 = vsel %vm790_vm0, %v971_v52, 0.0  ;;  %v923_v18 = vsel %vm655_vm5, 0.0, %v917_v54  ;;  %v1102_v43 = vld [vmem:[%s3502_s9 + $0x48] sm:$0xff] }
 0x200   : > { %v977_v58 = vmul.f32 %v975_v56, %v2761_v9  ;;  %v976_v59 = vmul.f32 %v972_v55, %v2771_v16  ;;  %v956_v9 = vmul.f32 %v952_v0, %v2787_v26  ;;  %v936_v26 = vmul.f32 %v892_v34, %v2817_v42  ;;  %v1120_v34 = vld [vmem:[%s3502_s9 + $0xd8] sm:$0xff]  ;;  %v1114_v52 = vld [vmem:[%s3502_s9 + $0xa8] sm:$0xff]  ;;  %v1097_v55 = vld [vmem:[%s3502_s9 + $0x20] sm:$0xff] }
 0x201   : > { %v924_v28 = vmul.f32 %v923_v18, %v2841_v60  ;;  %v978_v60 = vld [vmem:[%s3569_s23] sm:$0xff]  ;;  %v1112_v56 = vld [vmem:[%s3502_s9 + $0x98] sm:$0xff]  ;;  %s3570_s23 = smov 1  }
 0x202   : > { %1002 = vmatprep.subr.mxu1 %v977_v58  ;;  %v929_v1 = vpop.permute.xlu1 %928  ;;  %v907_v16 = vpop.permute.xlu0 %906 }
 0x203   : > { %1003 = vmatpush1.msra.mxu1 %v976_v59  ;;  %v930_v20 = vsel %vm679_vm4, %v927_v40, %v929_v1  ;;  %v913_v25 = vsel %vm631_vm6, 0.0, %v907_v16  ;;  %v1118_v40 = vld [vmem:[%s3502_s9 + $0xc8] sm:$0xff]  ;;  %v1096_v59 = vld [vmem:[%s3502_s9 + $0x18] sm:$0xff]  ;;  %v1095_v1 = vld [vmem:[%s3502_s9 + $0x10] sm:$0xff] }
 0x204   : > { %1004 = vmatprep.subr.mxu1 %v967_v63  ;;  %v935_v39 = vmul.f32 %v930_v20, %v2827_v50  ;;  %v914_v47 = vmul.f32 %v913_v25, %v2854_v6  ;;  %v1124_v6 = vld [vmem:[%s3502_s9 + $0xf8] sm:$0xff]  ;;  %v1111_v63 = vld [vmem:[%s3502_s9 + $0x90] sm:$0xff] }
 0x205   : > { %1005 = vmatpush1.msra.mxu1 %v966_v3  ;;  %2176 = vmatprep.subr.mxu0 %v1124_v6 }
 0x206   : > { %1006 = vmatprep.subr.mxu1 %v957_v5  ;;  %v919_v12 = vpop.permute.xlu1 %918  ;;  %v897_v23 = vpop.permute.xlu0 %896  ;;  %v1094_v5 = vld [vmem:[%s3502_s9 + $0x8] sm:$0xff] }
 0x207   : > { %1007 = vmatpush1.msra.mxu1 %v956_v9  ;;  %v920_v15 = vsel %vm655_vm5, %v917_v54, %v919_v12  ;;  %v903_v42 = vsel %vm608_vm7, 0.0, %v897_v23  ;;  %v1113_v54 = vld [vmem:[%s3502_s9 + $0xa0] sm:$0xff]  ;;  %vm1783_vm5 = vcmask 785408  }
 0x208   : > { %1008 = vmatprep.subr.mxu1 %v947_v17  ;;  %v925_v41 = vmul.f32 %v920_v15, %v2844_v61  ;;  %v904_v61 = vmul.f32 %v903_v42, %v2867_v21  ;;  %v1123_v21 = vld [vmem:[%s3502_s9 + $0xf0] sm:$0xff]  ;;  %v1093_v9 = vld [vmem:[%s3502_s9] sm:$0xff] }
 0x209   : > { %1009 = vmatpush1.msra.mxu1 %v946_v13 }
 0x20a   : > { %1010 = vmatprep.subr.mxu1 %v937_v27  ;;  %v909_v19 = vpop.permute.xlu1 %908 }
 0x20b   : > { %v910_v24 = vsel %vm631_vm6, %v907_v16, %v909_v19  ;;  %1011 = vmatpush1.msra.mxu1 %v936_v26 }
 0x20c   : > { %1012 = vmatprep.subr.mxu1 %v935_v39  ;;  %v915_v50 = vmul.f32 %v910_v24, %v2857_v8  ;;  %v1108_v8 = vld [vmem:[%s3502_s9 + $0x78] sm:$0xff] }
 0x20d   : > { %1013 = vmatpush1.msra.mxu1 %v934_v36  ;;  %2177 = vmatpush3.msra.mxu0 %v1108_v8  ;;  %v1315_v8 = vld [vmem:[%s3498_s5] sm:$0xff] }
 0x20e   : > { %v899_v29 = vpop.permute.xlu1 %898  ;;  %1014 = vmatprep.subr.mxu1 %v925_v41  ;;  %2178 = vmatprep.subr.mxu0 %v1123_v21  ;;  %v1318_v21 = vld [vmem:[%s3499_s6 + $0x8] sm:$0xff] }
 0x20f   : > { %v900_v30 = vsel %vm608_vm7, %v897_v23, %v899_v29  ;;  %1015 = vmatpush1.msra.mxu1 %v924_v28 }
 0x210   : > { %v905_v10 = vmul.f32 %v900_v30, %v2870_v22  ;;  %1016 = vmatprep.subr.mxu1 %v915_v50  ;;  %v1107_v22 = vld [vmem:[%s3502_s9 + $0x70] sm:$0xff] }
 0x211   : > { %1017 = vmatpush1.msra.mxu1 %v914_v47  ;;  %2179 = vmatpush3.msra.mxu0 %v1107_v22  ;;  %v1317_v22 = vld [vmem:[%s3499_s6] sm:$0xff] }
 0x212   : > { %1018 = vmatprep.subr.mxu1 %v905_v10  ;;  %2180 = vmatprep.subr.mxu0 %v1122_v7  ;;  %v3063_v7 = vld [vmem:[%s3505_s12 + $0x8] ss:$0 sm:$0xff] }
 0x213   : > { %1019 = vmatpush1.msra.mxu1 %v904_v61  ;;  %2181 = vmatpush3.msra.mxu0 %v1106_v31  ;;  %v983_v57 = vpop.permute.xlu0 %982 }
 0x214   : > { %2146 = vmatmul.mubr.msk.f32.vlgmr.msra.gmra.mxu1 %vm817_vm8, %v978_v60  ;;  %2182 = vmatprep.subr.mxu0 %v1121_v32 }
 0x215   : > { %2183 = vmatpush3.msra.mxu0 %v1105_v33  ;;  %2303 = vmatprep.mubr.msk.f32.mxu1 %vm817_vm8, %v1315_v8  ;;  %v3068_v33 = vld [vmem:[%s3505_s12 + $0x7] ss:$0 sm:$0xff] }
 0x216   : > { %2184 = vmatprep.subr.mxu0 %v1120_v34 }
 0x217   : > { %2185 = vmatpush3.msra.mxu0 %v1104_v35 }
 0x218   : > { %2186 = vmatprep.subr.mxu0 %v1119_v37 }
 0x219   : > { %2187 = vmatpush3.msra.mxu0 %v1103_v38  ;;  %v3076_v38 = vld [vmem:[%s3505_s12 + $0x6] ss:$0 sm:$0xff] }
 0x21a   : > { %2188 = vmatprep.subr.mxu0 %v1118_v40 }
 0x21b   : > { %2189 = vmatpush3.msra.mxu0 %v1102_v43 }
 0x21c   : > { %2190 = vmatprep.subr.mxu0 %v1117_v44 }
 0x21d   : > { %2191 = vmatpush3.msra.mxu0 %v1101_v45  ;;  %v3082_v45 = vld [vmem:[%s3505_s12 + $0x5] ss:$0 sm:$0xff] }
 0x21e   : > { %2192 = vmatprep.subr.mxu0 %v1116_v46 }
 0x21f   : > { %2193 = vmatpush3.msra.mxu0 %v1100_v48 }
 0x220   : > { %2194 = vmatprep.subr.mxu0 %v1115_v49 }
 0x221   : > { %2195 = vmatpush3.msra.mxu0 %v1099_v51  ;;  %v3090_v51 = vld [vmem:[%s3505_s12 + $0x4] ss:$0 sm:$0xff] }
 0x222   : > { %2196 = vmatprep.subr.mxu0 %v1114_v52 }
 0x223   : > { %2197 = vmatpush3.msra.mxu0 %v1098_v53 }
 0x224   : > { %2198 = vmatprep.subr.mxu0 %v1113_v54 }
 0x225   : > { %2199 = vmatpush3.msra.mxu0 %v1097_v55  ;;  %v3096_v55 = vld [vmem:[%s3505_s12 + $0x3] ss:$0 sm:$0xff] }
 0x226   : > { %2200 = vmatprep.subr.mxu0 %v1112_v56 }
 0x227   : > { %2201 = vmatpush3.msra.mxu0 %v1096_v59 }
 0x228   : > { %2202 = vmatprep.subr.mxu0 %v1111_v63 }
 0x229   : > { %2203 = vmatpush3.msra.mxu0 %v1095_v1  ;;  %v3110_v1 = vld [vmem:[%s3505_s12 + $0x1] ss:$0 sm:$0xff] }
 0x22a   : > { %2204 = vmatprep.subr.mxu0 %v1110_v4 }
 0x22b   : > { %2205 = vmatpush3.msra.mxu0 %v1094_v5  ;;  %v3117_v5 = vld [vmem:[%s3505_s12] ss:$0 sm:$0xff] }
 0x22c   : > { %2206 = vmatprep.subr.mxu0 %v1109_v11 }
 0x22d   : > { %2207 = vmatpush3.msra.mxu0 %v1093_v9 }
 0x2d4   : > { %v1054_v58 = vpop.f32.mrf.mxu1 }
 0x2d5   : > { %v1055_v62 = vadd.f32 %v1054_v58, %v983_v57  ;;  %v3103_v58 = vld [vmem:[%s3505_s12 + $0x2] ss:$0 sm:$0xff] }
 0x2d6   : > { %v1056_v0 = vpop.f32.mrf.mxu1 }
 0x2d7   : > { %v1057_v3 = vadd.f32 %v1056_v0, %v983_v57  ;;  %v1059_v16 = vmax.f32 %v1055_v62, 0.0 }
 0x2d9   : > { %v1060_v17 = vmax.f32 %v1057_v3, 0.0 }
 0x2db   : > { %v2430_v12 = vpack.i.bf16 %v1059_v16, %v1060_v17 }
 0x2dd   : > { %2431 = vrot.lane.b32.xlu0 %v2430_v12, %s3562_s22  ;;  %2426 = vrot.lane.b32.xlu1 %v2430_v12, %s3564_s24 }
 0x2e1   : > { %2436 = vrot.lane.b32.xlu1 %v2430_v12, %s3561_s28  ;;  %s2548_s28 = smov 120  }
 0x34f   : > { %v2432_v13 = vpop.permute.xlu0 %2431  ;;  %v2427_v20 = vpop.permute.xlu1 %2426 }
 0x350   : > { %v2429_v14 = vunpack.i.h.bf16 %v2427_v20  ;;  %v2428_v27 = vunpack.i.l.bf16 %v2427_v20  ;;  %v2434_v15 = vunpack.i.h.bf16 %v2432_v13  ;;  %v2433_v26 = vunpack.i.l.bf16 %v2432_v13 }
 0x352   : > { %v1067_v39 = vsel %vm718_vm3, %v2429_v14, %v2428_v27  ;;  %v1070_v19 = vsel %vm718_vm3, %v2428_v27, 0.0  ;;  %v1077_v24 = vsel %vm766_vm1, %v2434_v15, %v2433_v26  ;;  %v1080_v25 = vsel %vm766_vm1, %v2433_v26, 0.0 }
 0x353   : > { %v2437_v18 = vpop.permute.xlu1 %2436  ;;  %v1071_v42 = vmax.f32 %v1059_v16, %v1067_v39  ;;  %v1072_v50 = vmax.f32 %v1060_v17, %v1070_v19  ;;  %v1316_v17 = vld [vmem:[%s3498_s5 + $0x8] sm:$0xff]  ;;  %v1500_v19 = vld [vmem:[%s3501_s8] sm:$0xff]  ;;  %vm1778_vm3 = vcmask 392192  }
 0x354   : > { %v2439_v36 = vunpack.i.h.bf16 %v2437_v18  ;;  %v2438_v23 = vunpack.i.l.bf16 %v2437_v18  ;;  %v1497_v39 = vld [vmem:[%s3500_s7 + $0x8] sm:$0xff] }
 0x356   : > { %v1085_v41 = vsel %vm790_vm0, %v2439_v36, %v2438_v23  ;;  %v1088_v28 = vsel %vm790_vm0, %v2438_v23, 0.0  ;;  %v1501_v36 = vld [vmem:[%s3501_s8 + $0x8] sm:$0xff]  ;;  %vm1635_vm0 = vcmask 523264  }
 0x357   : > { %v1089_v29 = vmax.f32 %v1077_v24, %v1085_v41  ;;  %v1090_v47 = vmax.f32 %v1080_v25, %v1088_v28 }
 0x359   : > { %v1092_v30 = vmax.f32 %v1072_v50, %v1090_v47  ;;  %v1091_v10 = vmax.f32 %v1071_v42, %v1089_v29 }
 0x35b   : > { %1189 = vmatprep.mubr.f32.mxu0 %v1092_v30 }
 0x35c   : > { %1190 = vmatmul.mubr.f32.vlgmr.msra.gmra.mxu0 %v1091_v10 }
 0x41c   : > { %v2208_v61 = vpop.f32.mrf.mxu0 }
 0x41e   : > { %v2209_v60 = vpop.f32.mrf.mxu0 }
 0x41f   : > { %v2210_v6 = vadd.f32 %v2209_v60, %v2208_v61 }
 0x421   : > { %1287 = vrot.lane.b32.xlu1 %v2210_v6, %s2548_s28  ;;  %1301 = vrot.lane.b32.xlu0 %v2210_v6, %s3535_s0  ;;  %v1258_v57 = vmul.f32 %v2210_v6, %v3090_v51  ;;  %s3571_s0 = smov 7  }
 0x425   : > { %1259 = vrot.lane.b32.xlu1 %v2210_v6, %s3564_s24  ;;  %1273 = vrot.lane.b32.xlu0 %v2210_v6, %s2550_s26 }
 0x429   : > { %1223 = vrot.lane.b32.xlu1 %v2210_v6, %s3537_s2  ;;  %1237 = vrot.lane.b32.xlu0 %v2210_v6, %s3570_s23  ;;  %s3458_s2 = scalar_lea.hbm %s3512_s19, %s2172_s29 }
 0x42d   : > { %1196 = vrot.lane.b32.xlu1 %v2210_v6, %s3539_s20  ;;  %1209 = vrot.lane.b32.xlu0 %v2210_v6, %s3541_s27  ;;  %s3574_s27 = smov 119  }
 0x431   : > { %1326 = vperm.xlu0 %2424, %v1318_v21   ;;  %1321 = vperm.xlu1 %2440, %v1317_v22  }
 0x493   : > { %v1288_v31 = vpop.permute.xlu1 %1287  ;;  %v1302_v32 = vpop.permute.xlu0 %1301 }
 0x494   : > { %v1291_v34 = vsel %vm1290_vm9, %v1288_v31, 0.0  ;;  %v1305_v35 = vsel %vm1304_vm10, %v1302_v32, 0.0 }
 0x495   : > { %v1314_v37 = vmul.f32 %v3063_v7, %v1305_v35  ;;  %v1300_v40 = vmul.f32 %v3068_v33, %v1291_v34 }
 0x497   : > { %v1260_v43 = vpop.permute.xlu1 %1259  ;;  %2285 = vmatprep.subr.mxu1 %v1314_v37  ;;  %v1274_v44 = vpop.permute.xlu0 %1273 }
 0x498   : > { %v1263_v46 = vsel %vm1262_vm11, %v1260_v43, 0.0  ;;  %v1277_v48 = vsel %vm1276_vm12, %v1274_v44, 0.0  ;;  %2286 = vmatpush3.msra.mxu1 %v1314_v37 }
 0x499   : > { %v1286_v49 = vmul.f32 %v3076_v38, %v1277_v48  ;;  %2287 = vmatprep.subr.mxu1 %v1300_v40  ;;  %v1272_v52 = vmul.f32 %v3082_v45, %v1263_v46 }
 0x49a   : > { %2288 = vmatpush3.msra.mxu1 %v1300_v40 }
 0x49b   : > { %v1224_v53 = vpop.permute.xlu1 %1223  ;;  %2289 = vmatprep.subr.mxu1 %v1286_v49  ;;  %v1238_v54 = vpop.permute.xlu0 %1237 }
 0x49c   : > { %v1240_v56 = vsel %vm679_vm4, 0.0, %v1238_v54  ;;  %2290 = vmatpush3.msra.mxu1 %v1286_v49  ;;  %v1227_v59 = vsel %vm1226_vm13, 0.0, %v1224_v53 }
 0x49d   : > { %2291 = vmatprep.subr.mxu1 %v1272_v52  ;;  %v1249_v62 = vmul.f32 %v3096_v55, %v1240_v56  ;;  %v1236_v4 = vmul.f32 %v3103_v58, %v1227_v59 }
 0x49e   : > { %2292 = vmatpush3.msra.mxu1 %v1272_v52 }
 0x49f   : > { %v1197_v63 = vpop.permute.xlu1 %1196  ;;  %v1210_v0 = vpop.permute.xlu0 %1209  ;;  %2293 = vmatprep.subr.mxu1 %v1258_v57 }
 0x4a0   : > { %v1213_v3 = vsel %vm1212_vm14, 0.0, %v1210_v0  ;;  %2294 = vmatpush3.msra.mxu1 %v1258_v57  ;;  %v1200_v11 = vsel %vm1199_vm15, 0.0, %v1197_v63 }
 0x4a1   : > { %2295 = vmatprep.subr.mxu1 %v1249_v62  ;;  %v1222_v9 = vmul.f32 %v3110_v1, %v1213_v3  ;;  %v1208_v16 = vmul.f32 %v3117_v5, %v1200_v11 }
 0x4a2   : > { %2296 = vmatpush3.msra.mxu1 %v1249_v62 }
 0x4a3   : > { %2297 = vmatprep.subr.mxu1 %v1236_v4 }
 0x4a4   : > { %2298 = vmatpush3.msra.mxu1 %v1236_v4 }
 0x4a5   : > { %2299 = vmatprep.subr.mxu1 %v1222_v9 }
 0x4a6   : > { %2300 = vmatpush3.msra.mxu1 %v1222_v9 }
 0x4a7   : > { %2301 = vmatprep.subr.mxu1 %v1208_v16 }
 0x4a8   : > { %2302 = vmatpush3.msra.mxu1 %v1208_v16 }
 0x4a9   : > { %2304 = vmatmul.mubr.msk.f32.vlgmr.msra.gmra.mxu1 %vm817_vm8, %v1316_v17  ;;  %1518 = vmatprep.subr.mxu1 %v2543_v2 }
 0x4aa   : > { %2166 = vmatprep.mubr.msk.f32.mxu1 %vm631_vm6, %v1497_v39 }
 0x4ac   : > { %v1327_v12 = vpop.permute.xlu0 %1326  ;;  %v1322_v20 = vpop.permute.xlu1 %1321 }
 0x569   : > { %v2305_v13 = vpop.f32.mrf.mxu1 }
 0x56a   : > { %v1407_v14 = vadd.f32 %v2305_v13, %v1327_v12  ;;  %v1496_v12 = vld [vmem:[%s3500_s7] sm:$0xff]  ;;  %v1634_v13 = vld [vmem:[%s3503_s10 + $0x38] sm:$0xff] }
 0x56b   : > { %v1401_v27 = vpop.f32.mrf.mxu1  ;;  %2306 = vmatprep.subr.mxu0 %v1634_v13 }
 0x56c   : > { %v1411_v15 = vmax.f32 %v1407_v14, 0.0  ;;  %v1402_v26 = vadd.f32 %v1401_v27, %v1322_v20  ;;  %v1633_v20 = vld [vmem:[%s3503_s10 + $0x30] sm:$0xff]  ;;  %2307 = vmatpush3.msra.mxu0 %v1634_v13  ;;  %v1632_v14 = vld [vmem:[%s3503_s10 + $0x28] sm:$0xff]  ;;  %v1631_v27 = vld [vmem:[%s3503_s10 + $0x20] sm:$0xff] }
 0x56d   : > { %2308 = vmatprep.subr.mxu0 %v1633_v20 }
 0x56e   : > { %v1410_v18 = vmax.f32 %v1402_v26, 0.0  ;;  %1478 = vrot.lane.b32.xlu0 %v1411_v15, %s2548_s28  ;;  %v1455_v34 = vmul.f32 %v3090_v51, %v1411_v15  ;;  %2309 = vmatpush3.msra.mxu0 %v1633_v20  ;;  %v1629_v26 = vld [vmem:[%s3503_s10 + $0x10] sm:$0xff] }
 0x56f   : > { %2310 = vmatprep.subr.mxu0 %v1632_v14 }
 0x570   : > { %1476 = vrot.lane.b32.xlu1 %v1410_v18, %s2548_s28  ;;  %2311 = vmatpush3.msra.mxu0 %v1632_v14 }
 0x571   : > { %2312 = vmatprep.subr.mxu0 %v1631_v27 }
 0x572   : > { %1468 = vrot.lane.b32.xlu0 %v1411_v15, %s2550_s26  ;;  %2313 = vmatpush3.msra.mxu0 %v1631_v27 }
 0x574   : > { %1466 = vrot.lane.b32.xlu1 %v1410_v18, %s2550_s26  ;;  %s3573_s26 = smov 9  }
 0x576   : > { %1458 = vrot.lane.b32.xlu0 %v1411_v15, %s3564_s24 }
 0x578   : > { %1456 = vrot.lane.b32.xlu1 %v1410_v18, %s3564_s24 }
 0x57a   : > { %1446 = vrot.lane.b32.xlu0 %v1411_v15, %s3570_s23 }
 0x57c   : > { %1444 = vrot.lane.b32.xlu1 %v1410_v18, %s3570_s23 }
 0x57e   : > { %1436 = vrot.lane.b32.xlu0 %v1411_v15, %s3571_s0 }
 0x580   : > { %1434 = vrot.lane.b32.xlu1 %v1410_v18, %s3571_s0 }
 0x582   : > { %1426 = vrot.lane.b32.xlu0 %v1411_v15, %s3572_s4 }
 0x584   : > { %1424 = vrot.lane.b32.xlu1 %v1410_v18, %s3572_s4 }
 0x586   : > { %1416 = vrot.lane.b32.xlu0 %v1411_v15, %s3573_s26 }
 0x588   : > { %1414 = vrot.lane.b32.xlu1 %v1410_v18, %s3573_s26  ;;  %s593_s26 = sand.u32 1, %s2528_s30  }
 0x589   : > { %s2064_s20 = scalar_lea.sflag [#allocation3], %s593_s26 }
 0x58a   : > { %1488 = vrot.lane.b32.xlu0 %v1411_v15, %s3574_s27  ;;  %v1630_v15 = vld [vmem:[%s3503_s10 + $0x18] sm:$0xff] }
 0x58b   : > { %2314 = vmatprep.subr.mxu0 %v1630_v15 }
 0x58c   : > { %1486 = vrot.lane.b32.xlu1 %v1410_v18, %s3574_s27  ;;  %2315 = vmatpush3.msra.mxu0 %v1630_v15  ;;  %v1796_v15 = vld [vmem:[%s3506_s13 + $0x18] sm:$0xff] }
 0x58d   : > { %2316 = vmatprep.subr.mxu0 %v1629_v26 }
 0x58e   : > { %1504 = vperm.xlu0 %2424, %v1500_v19   ;;  %2317 = vmatpush3.msra.mxu0 %v1629_v26  ;;  %v1628_v19 = vld [vmem:[%s3503_s10 + $0x8] sm:$0xff]  ;;  %v1811_v26 = vld [vmem:[%s3506_s13 + $0x90] sm:$0xff] }
 0x58f   : > { %2318 = vmatprep.subr.mxu0 %v1628_v19 }
 0x590   : > { %1509 = vperm.xlu1 %2440, %v1501_v36   ;;  %2319 = vmatpush3.msra.mxu0 %v1628_v19 }
 0x5e0   : > { %v1479_v23 = vpop.permute.xlu0 %1478 }
 0x5e1   : > { %v1483_v24 = vsel %vm1290_vm9, %v1479_v23, 0.0 }
 0x5e2   : > { %v1485_v25 = vmul.f32 %v3068_v33, %v1483_v24  ;;  %v1477_v41 = vpop.permute.xlu1 %1476  ;;  %v1627_v24 = vld [vmem:[%s3503_s10] sm:$0xff] }
 0x5e3   : > { %v1482_v28 = vsel %vm1290_vm9, %v1477_v41, 0.0  ;;  %2320 = vmatprep.subr.mxu0 %v1627_v24 }
 0x5e4   : > { %v1484_v42 = vmul.f32 %v3068_v33, %v1482_v28  ;;  %1519 = vmatpush1.msra.mxu1 %v1485_v25  ;;  %v1469_v50 = vpop.permute.xlu0 %1468  ;;  %2321 = vmatpush3.msra.mxu0 %v1627_v24  ;;  %v1810_v24 = vld [vmem:[%s3506_s13 + $0x88] sm:$0xff] }
 0x5e5   : > { %v1473_v29 = vsel %vm1276_vm12, %v1469_v50, 0.0  ;;  %1520 = vmatprep.subr.mxu1 %v2543_v2 }
 0x5e6   : > { %v1475_v47 = vmul.f32 %v3076_v38, %v1473_v29  ;;  %1521 = vmatpush1.msra.mxu1 %v1484_v42  ;;  %v1467_v30 = vpop.permute.xlu1 %1466 }
 0x5e7   : > { %v1472_v10 = vsel %vm1276_vm12, %v1467_v30, 0.0  ;;  %1522 = vmatprep.subr.mxu1 %v2543_v2 }
 0x5e8   : > { %v1474_v61 = vmul.f32 %v3076_v38, %v1472_v10  ;;  %v1459_v60 = vpop.permute.xlu0 %1458  ;;  %1523 = vmatpush1.msra.mxu1 %v1475_v47  ;;  %v1454_v38 = vmul.f32 %v3090_v51, %v1410_v18 }
 0x5e9   : > { %v1463_v6 = vsel %vm1262_vm11, %v1459_v60, 0.0  ;;  %1524 = vmatprep.subr.mxu1 %v2543_v2 }
 0x5ea   : > { %v1465_v8 = vmul.f32 %v3082_v45, %v1463_v6  ;;  %1525 = vmatpush1.msra.mxu1 %v1474_v61  ;;  %v1457_v21 = vpop.permute.xlu1 %1456 }
 0x5eb   : > { %v1462_v22 = vsel %vm1262_vm11, %v1457_v21, 0.0  ;;  %1526 = vmatprep.subr.mxu1 %v2543_v2 }
 0x5ec   : > { %v1464_v31 = vmul.f32 %v3082_v45, %v1462_v22  ;;  %v1447_v32 = vpop.permute.xlu0 %1446  ;;  %1527 = vmatpush1.msra.mxu1 %v1465_v8 }
 0x5ed   : > { %1528 = vmatprep.subr.mxu1 %v2543_v2  ;;  %v1451_v35 = vsel %vm679_vm4, 0.0, %v1447_v32 }
 0x5ee   : > { %1529 = vmatpush1.msra.mxu1 %v1464_v31  ;;  %v1445_v33 = vpop.permute.xlu1 %1444  ;;  %v1453_v43 = vmul.f32 %v3096_v55, %v1451_v35 }
 0x5ef   : > { %1530 = vmatprep.subr.mxu1 %v2543_v2  ;;  %v1450_v40 = vsel %vm679_vm4, 0.0, %v1445_v33  ;;  %vm1781_vm4 = vcmask 654336  }
 0x5f0   : > { %v1437_v37 = vpop.permute.xlu0 %1436  ;;  %1531 = vmatpush1.msra.mxu1 %v1455_v34  ;;  %v1452_v46 = vmul.f32 %v3096_v55, %v1450_v40 }
 0x5f1   : > { %1532 = vmatprep.subr.mxu1 %v2543_v2  ;;  %v1441_v45 = vsel %vm1226_vm13, 0.0, %v1437_v37 }
 0x5f2   : > { %v1435_v44 = vpop.permute.xlu1 %1434  ;;  %1533 = vmatpush1.msra.mxu1 %v1454_v38  ;;  %v1443_v51 = vmul.f32 %v3103_v58, %v1441_v45  ;;  %v1808_v45 = vld [vmem:[%s3506_s13 + $0x78] sm:$0xff] }
 0x5f3   : > { %1534 = vmatprep.subr.mxu1 %v2543_v2  ;;  %v1440_v49 = vsel %vm1226_vm13, 0.0, %v1435_v44  ;;  %v1824_v44 = vld [vmem:[%s3506_s13 + $0xf8] sm:$0xff] }
 0x5f4   : > { %v1427_v48 = vpop.permute.xlu0 %1426  ;;  %1535 = vmatpush1.msra.mxu1 %v1453_v43  ;;  %v1442_v54 = vmul.f32 %v3103_v58, %v1440_v49  ;;  %2232 = vmatprep.subr.mxu0 %v1824_v44  ;;  %v1822_v49 = vld [vmem:[%s3506_s13 + $0xe8] sm:$0xff] }
 0x5f5   : > { %1536 = vmatprep.subr.mxu1 %v2543_v2  ;;  %v1431_v53 = vsel %vm1212_vm14, 0.0, %v1427_v48  ;;  %v1807_v48 = vld [vmem:[%s3506_s13 + $0x70] sm:$0xff] }
 0x5f6   : > { %v1425_v52 = vpop.permute.xlu1 %1424  ;;  %1537 = vmatpush1.msra.mxu1 %v1452_v46  ;;  %v1433_v57 = vmul.f32 %v3110_v1, %v1431_v53  ;;  %v1823_v46 = vld [vmem:[%s3506_s13 + $0xf0] sm:$0xff]  ;;  %v1805_v53 = vld [vmem:[%s3506_s13 + $0x60] sm:$0xff] }
 0x5f7   : > { %1538 = vmatprep.subr.mxu1 %v2543_v2  ;;  %v1430_v55 = vsel %vm1212_vm14, 0.0, %v1425_v52  ;;  %v1821_v52 = vld [vmem:[%s3506_s13 + $0xe0] sm:$0xff] }
 0x5f8   : > { %v1417_v56 = vpop.permute.xlu0 %1416  ;;  %1539 = vmatpush1.msra.mxu1 %v1443_v51  ;;  %v1432_v63 = vmul.f32 %v3110_v1, %v1430_v55  ;;  %v1806_v51 = vld [vmem:[%s3506_s13 + $0x68] sm:$0xff]  ;;  %v1819_v55 = vld [vmem:[%s3506_s13 + $0xd0] sm:$0xff] }
 0x5f9   : > { %1540 = vmatprep.subr.mxu1 %v2543_v2  ;;  %v1421_v62 = vsel %vm1199_vm15, 0.0, %v1417_v56  ;;  %v1804_v56 = vld [vmem:[%s3506_s13 + $0x58] sm:$0xff] }
 0x5fa   : > { %v1415_v59 = vpop.permute.xlu1 %1414  ;;  %1541 = vmatpush1.msra.mxu1 %v1442_v54  ;;  %v1423_v3 = vmul.f32 %v3117_v5, %v1421_v62  ;;  %v1820_v54 = vld [vmem:[%s3506_s13 + $0xd8] sm:$0xff]  ;;  %v1802_v62 = vld [vmem:[%s3506_s13 + $0x48] sm:$0xff] }
 0x5fb   : > { %1542 = vmatprep.subr.mxu1 %v2543_v2  ;;  %v1420_v58 = vsel %vm1199_vm15, 0.0, %v1415_v59  ;;  %v1818_v59 = vld [vmem:[%s3506_s13 + $0xc8] sm:$0xff] }
 0x5fc   : > { %v1489_v0 = vpop.permute.xlu0 %1488  ;;  %1543 = vmatpush1.msra.mxu1 %v1433_v57  ;;  %v1422_v9 = vmul.f32 %v3117_v5, %v1420_v58  ;;  %v1499_v5 = vld [vmem:[%s3500_s7 + $0x18] sm:$0xff]  ;;  %v1803_v57 = vld [vmem:[%s3506_s13 + $0x50] sm:$0xff] }
 0x5fd   : > { %1544 = vmatprep.subr.mxu1 %v2543_v2  ;;  %v1493_v11 = vsel %vm1304_vm10, %v1489_v0, 0.0  ;;  %v1801_v0 = vld [vmem:[%s3506_s13 + $0x40] sm:$0xff]  ;;  %v1816_v58 = vld [vmem:[%s3506_s13 + $0xb8] sm:$0xff] }
 0x5fe   : > { %v1487_v4 = vpop.permute.xlu1 %1486  ;;  %1545 = vmatpush1.msra.mxu1 %v1432_v63  ;;  %v1495_v1 = vmul.f32 %v3063_v7, %v1493_v11  ;;  %v1817_v63 = vld [vmem:[%s3506_s13 + $0xc0] sm:$0xff]  ;;  %v1799_v11 = vld [vmem:[%s3506_s13 + $0x30] sm:$0xff] }
 0x5ff   : > { %1546 = vmatprep.subr.mxu1 %v2543_v2  ;;  %v1492_v16 = vsel %vm1304_vm10, %v1487_v4, 0.0  ;;  %v1815_v4 = vld [vmem:[%s3506_s13 + $0xb0] sm:$0xff] }
 0x600   : > { %1547 = vmatpush1.msra.mxu1 %v1423_v3  ;;  %v1494_v17 = vmul.f32 %v3063_v7, %v1492_v16  ;;  %v1498_v7 = vld [vmem:[%s3500_s7 + $0x10] sm:$0xff]  ;;  %v1800_v3 = vld [vmem:[%s3506_s13 + $0x38] sm:$0xff]  ;;  %v1798_v16 = vld [vmem:[%s3506_s13 + $0x28] sm:$0xff] }
 0x601   : > { %1548 = vmatprep.subr.mxu1 %v2543_v2 }
 0x602   : > { %1549 = vmatpush1.msra.mxu1 %v1422_v9  ;;  %v1814_v9 = vld [vmem:[%s3506_s13 + $0xa8] sm:$0xff] }
 0x603   : > { %1578 = vmatprep.subr.mxu1 %v2543_v2 }
 0x604   : > { %1579 = vmatpush2.msra.mxu1 %v1495_v1 }
 0x605   : > { %1580 = vmatprep.subr.mxu1 %v2543_v2 }
 0x606   : > { %1581 = vmatpush2.msra.mxu1 %v1494_v17  ;;  %v1813_v17 = vld [vmem:[%s3506_s13 + $0xa0] sm:$0xff] }
 0x607   : > { %1583 = vmatmul.mubr.f32.vlgmr.msra.gmra.mxu1 %v1496_v12  ;;  %2325 = vmatprep.subr.mxu1 %v2543_v2  ;;  %v1797_v12 = vld [vmem:[%s3506_s13 + $0x20] sm:$0xff] }
 0x608   : > { %2167 = vmatprep.mubr.msk.f32.mxu1 %vm631_vm6, %v1499_v5 }
 0x609   : > { %v1505_v18 = vpop.permute.xlu0 %1504 }
 0x60b   : > { %1588 = vmatmul.mubr.f32.gmra.mxu1 %v1498_v7  ;;  %v1510_v41 = vpop.permute.xlu1 %1509  ;;  %v1812_v7 = vld [vmem:[%s3506_s13 + $0x98] sm:$0xff] }
 0x6c7   : > { %v1584_v39 = vpop.f32.mrf.mxu1 }
 0x6c8   : > { %v1585_v36 = vadd.f32 %v1584_v39, %v1505_v18  ;;  %v1795_v18 = vld [vmem:[%s3506_s13 + $0x10] sm:$0xff] }
 0x6c9   : > { %v1586_v23 = vpop.f32.mrf.mxu1 }
 0x6ca   : > { %v1593_v25 = vmax.f32 %v1585_v36, 0.0 }
 0x6cb   : > { %v1589_v28 = vpop.f32.mrf.mxu1 }
 0x6cc   : > { %v1590_v42 = vadd.f32 %v1589_v28, %v1510_v41  ;;  %1607 = vrot.lane.b32.xlu1 %v1593_v25, %s2548_s28  ;;  %1597 = vrot.lane.b32.xlu0 %v1593_v25, %s3564_s24 }
 0x6cd   : > { %v1591_v50 = vpop.f32.mrf.mxu1 }
 0x6ce   : > { %v1594_v29 = vmax.f32 %v1590_v42, 0.0  ;;  %v1809_v42 = vld [vmem:[%s3506_s13 + $0x80] sm:$0xff] }
 0x6d0   : > { %1599 = vrot.lane.b32.xlu1 %v1594_v29, %s3564_s24  ;;  %1615 = vrot.lane.b32.xlu0 %v1593_v25, %s3574_s27  ;;  %s2554_s24 = smov 32  }
 0x6d4   : > { %1617 = vrot.lane.b32.xlu1 %v1594_v29, %s3574_s27  ;;  %1609 = vrot.lane.b32.xlu0 %v1594_v29, %s2548_s28  ;;  %s2558_s28 = smov 80  }
 0x73e   : > { %v1608_v47 = vpop.permute.xlu1 %1607  ;;  %v1598_v30 = vpop.permute.xlu0 %1597 }
 0x73f   : > { %v1603_v10 = vsel %vm1262_vm11, %v1598_v30, 0.0  ;;  %v1613_v6 = vsel %vm1290_vm9, %v1608_v47, 0.0 }
 0x740   : > { %v1605_v21 = vmax.f32 %v1593_v25, %v1603_v10  ;;  %v1794_v25 = vld [vmem:[%s3506_s13 + $0x8] sm:$0xff]  ;;  %v1793_v10 = vld [vmem:[%s3506_s13] sm:$0xff] }
 0x742   : > { %v1600_v61 = vpop.permute.xlu1 %1599  ;;  %v1616_v60 = vpop.permute.xlu0 %1615 }
 0x743   : > { %v1621_v8 = vsel %vm1304_vm10, %v1616_v60, 0.0  ;;  %v1604_v31 = vsel %vm1262_vm11, %v1600_v61, 0.0  ;;  %v1904_v61 = vld [vmem:[%s3508_s15 + $0x38] sm:$0xff] }
 0x744   : > { %v1623_v22 = vmax.f32 %v1613_v6, %v1621_v8  ;;  %v1606_v38 = vmax.f32 %v1594_v29, %v1604_v31  ;;  %v1903_v8 = vld [vmem:[%s3508_s15 + $0x30] sm:$0xff]  ;;  %2326 = vmatpush3.msra.mxu1 %v1904_v61  ;;  %v1980_v61 = vld [vmem:[%s3510_s17] sm:$0xff] }
 0x745   : > { %2327 = vmatprep.subr.mxu1 %v2543_v2 }
 0x746   : > { %v1625_v32 = vmax.f32 %v1605_v21, %v1623_v22  ;;  %v1618_v33 = vpop.permute.xlu1 %1617  ;;  %v1610_v34 = vpop.permute.xlu0 %1609  ;;  %2328 = vmatpush3.msra.mxu1 %v1903_v8 }
 0x747   : > { %v1622_v35 = vsel %vm1304_vm10, %v1618_v33, 0.0  ;;  %v1614_v37 = vsel %vm1290_vm9, %v1610_v34, 0.0  ;;  %2329 = vmatprep.subr.mxu1 %v2543_v2 }
 0x748   : > { %v1624_v40 = vmax.f32 %v1614_v37, %v1622_v35  ;;  %2322 = vmatprep.mubr.msk.f32.mxu0 %vm1635_vm0, %v1625_v32  ;;  %v1902_v32 = vld [vmem:[%s3508_s15 + $0x28] sm:$0xff] }
 0x749   : > { %2330 = vmatpush3.msra.mxu1 %v1902_v32 }
 0x74a   : > { %v1626_v43 = vmax.f32 %v1606_v38, %v1624_v40  ;;  %2331 = vmatprep.subr.mxu1 %v2543_v2 }
 0x74c   : > { %2323 = vmatmul.mubr.msk.f32.vlgmr.msra.gmra.mxu0 %vm1635_vm0, %v1626_v43 }
 0x74d   : > { %2233 = vmatpush3.msra.mxu0 %v1808_v45 }
 0x74e   : > { %2234 = vmatprep.subr.mxu0 %v1823_v46 }
 0x74f   : > { %2235 = vmatpush3.msra.mxu0 %v1807_v48 }
 0x750   : > { %2236 = vmatprep.subr.mxu0 %v1822_v49 }
 0x751   : > { %2237 = vmatpush3.msra.mxu0 %v1806_v51 }
 0x752   : > { %2238 = vmatprep.subr.mxu0 %v1821_v52 }
 0x753   : > { %2239 = vmatpush3.msra.mxu0 %v1805_v53 }
 0x754   : > { %2240 = vmatprep.subr.mxu0 %v1820_v54 }
 0x755   : > { %2241 = vmatpush3.msra.mxu0 %v1804_v56 }
 0x756   : > { %2242 = vmatprep.subr.mxu0 %v1819_v55 }
 0x757   : > { %2243 = vmatpush3.msra.mxu0 %v1803_v57 }
 0x758   : > { %2244 = vmatprep.subr.mxu0 %v1818_v59 }
 0x759   : > { %2245 = vmatpush3.msra.mxu0 %v1802_v62 }
 0x75a   : > { %2246 = vmatprep.subr.mxu0 %v1817_v63 }
 0x75b   : > { %2247 = vmatpush3.msra.mxu0 %v1801_v0 }
 0x75c   : > { %2248 = vmatprep.subr.mxu0 %v1816_v58 }
 0x75d   : > { %2249 = vmatpush3.msra.mxu0 %v1800_v3 }
 0x75e   : > { %2250 = vmatprep.subr.mxu0 %v1815_v4 }
 0x75f   : > { %2251 = vmatpush3.msra.mxu0 %v1799_v11 }
 0x760   : > { %2252 = vmatprep.subr.mxu0 %v1814_v9 }
 0x761   : > { %2253 = vmatpush3.msra.mxu0 %v1798_v16 }
 0x762   : > { %2254 = vmatprep.subr.mxu0 %v1813_v17 }
 0x763   : > { %2255 = vmatpush3.msra.mxu0 %v1797_v12 }
 0x764   : > { %2256 = vmatprep.subr.mxu0 %v1812_v7 }
 0x765   : > { %2257 = vmatpush3.msra.mxu0 %v1796_v15  ;;  %v1900_v15 = vld [vmem:[%s3508_s15 + $0x18] sm:$0xff] }
 0x766   : > { %2258 = vmatprep.subr.mxu0 %v1811_v26  ;;  %v1899_v26 = vld [vmem:[%s3508_s15 + $0x10] sm:$0xff] }
 0x767   : > { %2259 = vmatpush3.msra.mxu0 %v1795_v18  ;;  %v1898_v18 = vld [vmem:[%s3508_s15 + $0x8] sm:$0xff] }
 0x768   : > { %2260 = vmatprep.subr.mxu0 %v1810_v24 }
 0x769   : > { %2261 = vmatpush3.msra.mxu0 %v1794_v25 }
 0x76a   : > { %2262 = vmatprep.subr.mxu0 %v1809_v42  ;;  %v1986_v42 = vld [vmem:[%s3510_s17 + $0x30] sm:$0xff] }
 0x76b   : > { %2263 = vmatpush3.msra.mxu0 %v1793_v10  ;;  %v1981_v10 = vld [vmem:[%s3510_s17 + $0x8] sm:$0xff] }
 0x80c   : > { %v3319_v1 = vpop.f32.mrf.mxu0 }
 0x80d   : > { %v1751_v20 = vrot.slane %v3319_v1, 2  ;;  %v1747_v27 = vrot.slane %v3319_v1, 1  ;;  %v1759_v41 = vrot.slane %v3319_v1, 4  ;;  %v1755_v28 = vrot.slane %v3319_v1, 3 }
 0x80e   : > { %v3327_v5 = vpop.f32.mrf.mxu0  ;;  %v1767_v60 = vrot.slane %v3319_v1, 6  ;;  %v1763_v6 = vrot.slane %v3319_v1, 5  ;;  %v1771_v33 = vrot.slane %v3319_v1, 7 }
 0x80f   : > { %v1722_v13 = vrot.slane %v3327_v5, 2  ;;  %v1718_v14 = vrot.slane %v3327_v5, 1  ;;  %v1730_v36 = vrot.slane %v3327_v5, 4  ;;  %v1726_v23 = vrot.slane %v3327_v5, 3 }
 0x810   : > { %v1738_v47 = vrot.slane %v3327_v5, 6  ;;  %v1734_v30 = vrot.slane %v3327_v5, 5  ;;  %v1742_v31 = vrot.slane %v3327_v5, 7 }
 0x811   : > { %v2446_v39 = vpack.i.bf16 %v1722_v13, %v1751_v20  ;;  %v2441_v19 = vpack.i.bf16 %v1718_v14, %v1747_v27  ;;  %v2456_v50 = vpack.i.bf16 %v1730_v36, %v1759_v41  ;;  %v2451_v29 = vpack.i.bf16 %v1726_v23, %v1755_v28  ;;  %v1901_v27 = vld [vmem:[%s3508_s15 + $0x20] sm:$0xff]  ;;  %v1987_v28 = vld [vmem:[%s3510_s17 + $0x38] sm:$0xff] }
 0x812   : > { %v2466_v21 = vpack.i.bf16 %v1738_v47, %v1767_v60  ;;  %v2461_v22 = vpack.i.bf16 %v1734_v30, %v1763_v6  ;;  %v2471_v34 = vpack.i.bf16 %v1742_v31, %v1771_v33  ;;  %2332 = vmatpush3.msra.mxu1 %v1901_v27  ;;  %v1825_v36 = vld [vmem:[%s3507_s14] sm:$0x1]  ;;  %v1983_v47 = vld [vmem:[%s3510_s17 + $0x18] sm:$0xff]  ;;  %v1982_v30 = vld [vmem:[%s3510_s17 + $0x10] sm:$0xff] }
 0x813   : > { %2447 = vrot.lane.b32.xlu1 %v2446_v39, %s2554_s24  ;;  %2442 = vrot.lane.b32.xlu0 %v2441_v19, %s3566_s25  ;;  %s2557_s24 = smov 96   ;;  %v1897_v39 = vld [vmem:[%s3508_s15] sm:$0xff] }
 0x814   : > { %2333 = vmatprep.subr.mxu1 %v2543_v2  ;;  %v1905_v60 = vld [vmem:[%s3509_s16] sm:$0x1] }
 0x815   : > { %2334 = vmatpush3.msra.mxu1 %v1900_v15  ;;  %v1988_v31 = vld [vmem:[%s3511_s18] sm:$0x1] }
 0x816   : > { %2335 = vmatprep.subr.mxu1 %v2543_v2 }
 0x817   : > { %2457 = vrot.lane.b32.xlu1 %v2456_v50, %s2555_s21  ;;  %2452 = vrot.lane.b32.xlu0 %v2451_v29, %s2556_s11  ;;  %v1985_v50 = vld [vmem:[%s3510_s17 + $0x28] sm:$0xff]  ;;  %v1984_v29 = vld [vmem:[%s3510_s17 + $0x20] sm:$0xff]  ;;  %s594_s21 = scalar_lea.vmem [#allocation2], %s593_s26 }
 0x818   : > { %2336 = vmatpush3.msra.mxu1 %v1899_v26  ;;  %s2076_s11 = sshll.u32 %s594_s21, 4  ;;  %s2077_s11 = int_to_ptr.vmem [resolvable:$true] %s2076_s11 }
 0x819   : > { %2337 = vmatprep.subr.mxu1 %v2543_v2 }
 0x81a   : > { %2338 = vmatpush3.msra.mxu1 %v1898_v18 }
 0x81b   : > { %2467 = vrot.lane.b32.xlu1 %v2466_v21, %s2557_s24  ;;  %2462 = vrot.lane.b32.xlu0 %v2461_v22, %s2558_s28  ;;  %s2476_s24 = scalar_lea.vmem %s2077_s11, 16  ;;  %s2560_s28 = smov [#allocation2]  }
 0x81c   : > { %2339 = vmatprep.subr.mxu1 %v2543_v2  ;;  %p2477_p11 = scmp.ne.s32.totalorder %s2077_s11, %s2476_s24  ;;  %s2480_s1 = sshll.u32 %s2560_s28, 4  ;;  %s2481_s1 = int_to_ptr.vmem [resolvable:$false] %s2480_s1 }
 0x81d   : > { %2340 = vmatpush3.msra.mxu1 %v1897_v39  ;;  %p2483_p0 = scmp.lt.s32.totalorder %s2077_s11, %s2481_s1 }
 0x81e   : > { %2344 = vmatprep.subr.mxu1 %v2543_v2  ;;  %p2478_p12 = pnand %p2477_p11, %p2699_p5 }
 0x81f   : > { %2472 = vrot.lane.b32.xlu0 %v2471_v34, %s3562_s22  ;;  %s2482_s22 = scalar_lea.vmem %s2481_s1, 32 }
 0x820   : > { %p2479_p13 = pneg %p2478_p12  ;;  %p2484_p1 = scmp.lt.s32.totalorder %s2482_s22, %s2476_s24 }
 0x822   : > { %p2485_p2 = por %p2484_p1, %p2483_p0 }
 0x824   : > { %p2486_p3 = pnand %p2485_p2, %p2479_p13 }
 0x885   : > { %v2448_v35 = vpop.permute.xlu1 %2447  ;;  %v2443_v37 = vpop.permute.xlu0 %2442 }
 0x886   : > { %v2445_v38 = vunpack.i.h.bf16 %v2443_v37  ;;  %v2444_v40 = vunpack.i.l.bf16 %v2443_v37  ;;  %v2450_v43 = vunpack.i.h.bf16 %v2448_v35  ;;  %v2449_v44 = vunpack.i.l.bf16 %v2448_v35 }
 0x888   : > { %v1775_v45 = vsel %vm631_vm6, %v3327_v5, %v2445_v38  ;;  %v1786_v46 = vsel %vm631_vm6, %v3319_v1, %v2444_v40 }
 0x889   : > { %v2458_v48 = vpop.permute.xlu1 %2457  ;;  %v2453_v49 = vpop.permute.xlu0 %2452  ;;  %v1777_v56 = vsel %vm1776_vm2, %v1775_v45, %v2450_v43  ;;  %v1787_v55 = vsel %vm1776_vm2, %v1786_v46, %v2449_v44 }
 0x88a   : > { %v2455_v51 = vunpack.i.h.bf16 %v2453_v49  ;;  %v2454_v52 = vunpack.i.l.bf16 %v2453_v49  ;;  %v2460_v53 = vunpack.i.h.bf16 %v2458_v48  ;;  %v2459_v54 = vunpack.i.l.bf16 %v2458_v48 }
 0x88c   : > { %v1779_v57 = vsel %vm1778_vm3, %v1777_v56, %v2455_v51  ;;  %v1788_v59 = vsel %vm1778_vm3, %v1787_v55, %v2454_v52 }
 0x88d   : > { %v2468_v62 = vpop.permute.xlu1 %2467  ;;  %v2463_v63 = vpop.permute.xlu0 %2462  ;;  %v1780_v11 = vsel %vm1635_vm0, %v1779_v57, %v2460_v53  ;;  %v1789_v9 = vsel %vm1635_vm0, %v1788_v59, %v2459_v54 }
 0x88e   : > { %v2465_v0 = vunpack.i.h.bf16 %v2463_v63  ;;  %v2464_v58 = vunpack.i.l.bf16 %v2463_v63  ;;  %v2470_v3 = vunpack.i.h.bf16 %v2468_v62  ;;  %v2469_v4 = vunpack.i.l.bf16 %v2468_v62 }
 0x890   : > { %v1782_v16 = vsel %vm1781_vm4, %v1780_v11, %v2465_v0  ;;  %v1790_v1 = vsel %vm1781_vm4, %v1789_v9, %v2464_v58 }
 0x891   : > { %v2473_v17 = vpop.permute.xlu0 %2472  ;;  %v1791_v7 = vsel %vm1783_vm5, %v1790_v1, %v2469_v4  ;;  %v1784_v13 = vsel %vm1783_vm5, %v1782_v16, %v2470_v3 }
 0x892   : > { %v2475_v12 = vunpack.i.h.bf16 %v2473_v17  ;;  %v2474_v5 = vunpack.i.l.bf16 %v2473_v17 }
 0x894   : > { %v1792_v20 = vsel %vm766_vm1, %v1791_v7, %v2474_v5  ;;  %v1785_v14 = vsel %vm766_vm1, %v1784_v13, %v2475_v12  ;;  %vm2559_vm1 = vmmov 0  }
 0x895   : > { %1890 = vmatprep.mubr.f32.mxu0 %v1792_v20  ;;  %2341 = vmatprep.mubr.msk.f32.mxu1 %vm2559_vm1, %v2543_v2 }
 0x896   : > { %1891 = vmatmul.mubr.f32.vlgmr.msra.gmra.mxu0 %v1785_v14 }
 0x956   : > { %v2264_v19 = vpop.f32.mrf.mxu0 }
 0x958   : > { %v2265_v23 = vpop.f32.mrf.mxu0 }
 0x959   : > { %v2266_v24 = vadd.f32 %v2265_v23, %v2264_v19 }
 0x95b   : > { %v1893_v25 = vadd.f32 %v2266_v24, %v1825_v36 }
 0x95d   : > { %v1896_v41 = vmax.f32 %v1893_v25, 0.0 }
 0x95f   : > { %2342 = vmatmul.mubr.msk.f32.vlgmr.msra.gmra.mxu1 %vm1635_vm0, %v1896_v41 }
 0x960   : > { %2345 = vmatpush3.msra.mxu1 %v1987_v28  ;;  %2360 = vmatprep.mubr.msk.f32.mxu1 %vm2559_vm1, %v2543_v2 }
 0x961   : > { %2346 = vmatprep.subr.mxu1 %v2543_v2 }
 0x962   : > { %2347 = vmatpush3.msra.mxu1 %v1986_v42 }
 0x963   : > { %2348 = vmatprep.subr.mxu1 %v2543_v2 }
 0x964   : > { %2349 = vmatpush3.msra.mxu1 %v1985_v50 }
 0x965   : > { %2350 = vmatprep.subr.mxu1 %v2543_v2 }
 0x966   : > { %2351 = vmatpush3.msra.mxu1 %v1984_v29 }
 0x967   : > { %2352 = vmatprep.subr.mxu1 %v2543_v2 }
 0x968   : > { %2353 = vmatpush3.msra.mxu1 %v1983_v47 }
 0x969   : > { %2354 = vmatprep.subr.mxu1 %v2543_v2 }
 0x96a   : > { %2355 = vmatpush3.msra.mxu1 %v1982_v30 }
 0x96b   : > { %2356 = vmatprep.subr.mxu1 %v2543_v2 }
 0x96c   : > { %2357 = vmatpush3.msra.mxu1 %v1981_v10 }
 0x96d   : > { %2358 = vmatprep.subr.mxu1 %v2543_v2 }
 0x96e   : > { %2359 = vmatpush3.msra.mxu1 %v1980_v61 }
 0xa1f   : > { %v1975_v6 = vpop.f32.mrf.mxu1 }
 0xa20   : > { %v1976_v8 = vadd.f32 %v1975_v6, %v1905_v60 }
 0xa21   : > { %v2343_v21 = vpop.f32.mrf.mxu1 }
 0xa22   : > { %v1979_v22 = vmax.f32 %v1976_v8, 0.0 }
 0xa24   : > { %2361 = vmatmul.mubr.msk.f32.vlgmr.msra.gmra.mxu1 %vm1635_vm0, %v1979_v22 }
 0xae4   : > { %v2058_v2 = vpop.f32.mrf.mxu1 }
 0xae5   : > { %v2059_v32 = vadd.f32 %v2058_v2, %v1988_v31 }
 0xae6   : > { %v2362_v33 = vpop.f32.mrf.mxu1 }
 0xae7   : > { %2062 = vst [vmem:[%s594_s21] sm:$0x1] %v2059_v32 }
 0xae8   : > { %2489 = shalt.err (!%p2486_p3)
}
 0xae9   : > { %s2490_s27 = scalar_lea.hbm %s3458_s2, 16  ;;  %s2494_s25 = scalar_lea.hbm %s3512_s19, 32 }
 0xaea   : > { %p2491_p4 = scmp.ne.s32.totalorder %s3458_s2, %s2490_s27  ;;  %p2495_p9 = scmp.lt.s32.totalorder %s3458_s2, %s3512_s19 }
 0xaeb   : > { %p2496_p10 = scmp.lt.s32.totalorder %s2494_s25, %s2490_s27 }
 0xaec   : > { %p2492_p7 = pnand %p2491_p4, %p2699_p5 }
 0xaed   : > { %p2497_p11 = por %p2496_p10, %p2495_p9 }
 0xaee   : > { %p2493_p8 = pneg %p2492_p7 }
 0xaf0   : > { %p2498_p12 = pnand %p2497_p11, %p2493_p8 }
 0xaf2   : > { %2501 = shalt.err (!%p2498_p12)
}
 0xaf3   : > { %2363 = dma.vmem_to_hbm [thread:$0]  (%p2699_p5), %s2077_s11, 16, %s3458_s2, %s2064_s20  }
 0xaf4 PF: > { %s3575_s0 = sld [smem:[#allocation7_spill]] }
 0xaf5   : > { %s3576_s4 = sld [smem:[#allocation5_spill]] }
 0xafa   : > { %p2369_p13 = scmp.ge.s32.totalorder %s3575_s0, 2 }
 0xafb   : > { %s2088_s28 = sand.u32 1, %s3576_s4  }
 0xafc   : > { %p2366_p0 = pnand %p2369_p13, %p2703_p6  ;;  %s2089_s1 = scalar_lea.sflag [#allocation3], %s2088_s28 }
 0xafe   : > { %p2367_p1 = pneg %p2366_p0 }
 0xb00   : > { %2519 = dma.done.wait (%p2367_p1), %s2089_s1, 16  }
 0xb01   : > { %2521 = vsyncadd (%p2367_p1), %s2089_s1, 4294967280  ;;  %s3578_s21 = sld [smem:[#allocation8_spill]]  ;;  %s3581_s0 = smov %s2528_s30 }
 0xb02   : > { %s3579_s22 = sld [smem:[#allocation6_spill]] }
 0xb03   : > { %s3580_s20 = sld [smem:[#allocation9_spill]] }
 0xb07   : > { %p29_p2 = scmp.ge.s32.totalorder %s3578_s21, 4  }
 0xb08   : > { %s3582_s30 = smov %s3579_s22 }
 0xb09   :  { %31 = sbr.rel (!%p29_p2) target bundleno = 10 (0xa), region = 147 }
 0xb0e   :  { %2093 = vsyncpa [#allocation3], 1 }
 0xb0f   :  { %2095 = vsyncpa [#allocation3 + $0x1], 1 }

</bundles_post_ra>
